<compile_context>
chip_gen: v5e
topology: v5e:2x2
jax: 0.10.0
libtpu: 0.0.40
codegen_flags: <defaults>
</compile_context>

<pallas_src>
import functools

import jax
import jax.numpy as jnp
from jax.experimental import pallas as pl
from jax.experimental.pallas import tpu as pltpu

LANE = 128
NUM_LAYERS = 3


def _round_up(x, m):
    return ((x + m - 1) // m) * m


def _pad2d(x, rows, cols):
    return jnp.pad(x, ((0, rows - x.shape[0]), (0, cols - x.shape[1])))


def _choose_tiling(n):
    """Decoupled row (tr) / reduction (tk) tiles; n is padded to a tile multiple."""
    n_lane = _round_up(max(n, 1), LANE)
    if n_lane >= 8192:
        tk = 1024
    elif n_lane >= 2048:
        tk = 512
    elif n_lane >= 512:
        tk = 256
    else:
        tk = n_lane
    tr = min(512, tk)                  # tk is always a multiple of tr
    n_pad = _round_up(n_lane, tk)
    return n_pad, tr, tk


def _physical_vmem_bytes():
    try:
        return int(pltpu.get_tpu_info().vmem_capacity_bytes)
    except Exception:
        return 64 << 20                # conservative: v7x per-TensorCore VMEM


# ---------------------------------------------------------------------------
# Fused Pallas kernel
# ---------------------------------------------------------------------------
def _fused_gcn_kernel(a_in_ref, x_ref, w_ref, b_ref, p_ref, wl_ref, bl_ref,
                      o_ref, *scratch, a_resident):
    """3x (A_hat @ (h @ W_l) + b_l [+ReLU]) then pool + Linear, fully fused.

    Grid = (layer, row_tile, reduction_tile).  h / Z stay resident in VMEM; when
    `a_resident`, A_hat is copied into VMEM once and sliced per (i, k) tile.
    """
    if a_resident:
        a_vmem, h_ref, z_ref, acc_ref, pooled_ref = scratch
    else:
        a_vmem = None
        h_ref, z_ref, acc_ref, pooled_ref = scratch

    l = pl.program_id(0)               # layer
    i = pl.program_id(1)               # output row tile
    k = pl.program_id(2)               # reduction (A_hat column) tile
    num_l = pl.num_programs(0)
    num_i = pl.num_programs(1)
    num_k = pl.num_programs(2)
    tr = acc_ref.shape[0]
    tk = x_ref.shape[0]

    # One-time init: zero the pooled accumulator and (if it fits) copy A_hat
    # HBM -> VMEM exactly once for all three layers.
    @pl.when((l == 0) & (i == 0) & (k == 0))
    def _init():
        pooled_ref[...] = jnp.zeros_like(pooled_ref)
        if a_resident:
            pltpu.sync_copy(a_in_ref, a_vmem)

    rs = pl.ds(pl.multiple_of(i * tr, tr), tr)      # rows of this output tile
    ks = pl.ds(pl.multiple_of(k * tk, tk), tk)      # rows of this reduction tile

    if a_resident:
        a_tile = a_vmem[i * num_k + k]              # (tr, tk) bf16, VMEM resident
    else:
        a_tile = a_in_ref[...]                      # (tr, tk) bf16, streamed

    @pl.when(k == 0)
    def _zero_acc():
        acc_ref[...] = jnp.zeros_like(acc_ref)

    # Feature transform Z = h_prev @ W_l: computed once per layer (during the first
    # row tile) and fed straight into the aggregation (no store->reload round trip).
    def _transform_and_aggregate(src):
        z = jnp.dot(src, w_ref[...], preferred_element_type=jnp.float32)
        zb = z.astype(z_ref.dtype)
        z_ref[ks, :] = zb                            # reused by row tiles i > 0
        acc_ref[...] += jnp.dot(a_tile, zb, preferred_element_type=jnp.float32)

    @pl.when((i == 0) & (l == 0))
    def _transform_layer0():                         # layer 0 reads x tiles directly
        _transform_and_aggregate(x_ref[...])

    @pl.when((i == 0) & (l > 0))
    def _transform_hidden():
        _transform_and_aggregate(h_ref[ks, :])

    @pl.when(i > 0)
    def _aggregate():
        acc_ref[...] += jnp.dot(a_tile, z_ref[ks, :],
                                preferred_element_type=jnp.float32)

    # Row-tile epilogue: bias (+ ReLU on layers 0/1) in f32; the last layer skips the
    # h store and folds global_mean_pool + final Linear instead.
    @pl.when(k == num_k - 1)
    def _finalize_row_tile():
        out = acc_ref[...] + b_ref[...]

        @pl.when(l < num_l - 1)
        def _store_hidden():
            h_ref[rs, :] = jnp.maximum(out, 0.0).astype(h_ref.dtype)

        @pl.when(l == num_l - 1)
        def _pool():
            # global_mean_pool as P[:, rows] @ h3 (rows of P already hold 1/|graph g|).
            pooled_ref[...] += jnp.dot(p_ref[i], out,
                                       preferred_element_type=jnp.float32)

            @pl.when(i == num_i - 1)
            def _final_linear():
                # F.dropout(p=0.5, training=False) is the identity in eval mode.
                logits = jnp.dot(pooled_ref[...], wl_ref[...],
                                 preferred_element_type=jnp.float32) + bl_ref[...]
                o_ref[...] = logits.astype(o_ref.dtype)


# ---------------------------------------------------------------------------
# Plain-JAX glue: normalized adjacency, pooling matrix, parameters
# ---------------------------------------------------------------------------
def build_normalized_adjacency(edge_index, num_nodes):
    """D^-1/2 (A + I) D^-1/2 matching PyG gcn_norm: duplicate edges are scatter-ADDED,
    and a weight-1 self loop is added only where missing."""
    row, col = edge_index[0], edge_index[1]
    a = jnp.zeros((num_nodes, num_nodes), dtype=jnp.float32)
    a = a.at[row, col].add(1.0)
    diag = jnp.diagonal(a)
    a = a + jnp.diag(jnp.where(diag == 0.0, 1.0, 0.0))
    deg = jnp.sum(a, axis=1)
    d_inv_sqrt = jnp.where(deg > 0, jax.lax.rsqrt(deg), 0.0)
    return a * d_inv_sqrt[:, None] * d_inv_sqrt[None, :]


def build_pool_matrix(batch, num_graph_rows, num_node_cols):
    """P[g, n] = 1/|graph g| if batch[n] == g else 0, zero-padded so padded graphs /
    nodes contribute nothing."""
    n = batch.shape[0]
    one_hot = (batch[None, :] == jnp.arange(num_graph_rows)[:, None]).astype(jnp.float32)
    counts = jnp.maximum(one_hot.sum(axis=1, keepdims=True), 1.0)
    p = one_hot / counts
    return jnp.pad(p, ((0, 0), (0, num_node_cols - n)))


def init_params(key, num_node_features, hidden_channels, num_classes):
    ks = jax.random.split(key, 4)

    def glorot(k, shape):
        limit = jnp.sqrt(6.0 / (shape[0] + shape[1]))
        return jax.random.uniform(k, shape, jnp.float32, -limit, limit)

    return {
        "w1": glorot(ks[0], (num_node_features, hidden_channels)),
        "b1": jnp.zeros((hidden_channels,), jnp.float32),
        "w2": glorot(ks[1], (hidden_channels, hidden_channels)),
        "b2": jnp.zeros((hidden_channels,), jnp.float32),
        "w3": glorot(ks[2], (hidden_channels, hidden_channels)),
        "b3": jnp.zeros((hidden_channels,), jnp.float32),
        "w_lin": glorot(ks[3], (hidden_channels, num_classes)),
        "b_lin": jnp.zeros((num_classes,), jnp.float32),
    }


def gcn_reference(params, x, edge_index, batch, num_graphs):
    """Pure f32 JAX reference of the module's forward pass (for validation)."""
    a_hat = build_normalized_adjacency(edge_index, x.shape[0])
    h = jnp.maximum(a_hat @ (x @ params["w1"]) + params["b1"], 0.0)
    h = jnp.maximum(a_hat @ (h @ params["w2"]) + params["b2"], 0.0)
    h = a_hat @ (h @ params["w3"]) + params["b3"]
    one_hot = (batch[None, :] == jnp.arange(num_graphs)[:, None]).astype(jnp.float32)
    pooled = (one_hot @ h) / jnp.maximum(one_hot.sum(axis=1, keepdims=True), 1.0)
    return pooled @ params["w_lin"] + params["b_lin"]


# ---------------------------------------------------------------------------
# Forward pass (one fused pallas_call)
# ---------------------------------------------------------------------------
def gcn_forward(params, x, edge_index, batch, num_graphs):
    n, f = x.shape
    hidden = params["w1"].shape[1]
    num_classes = params["w_lin"].shape[1]

    hp = _round_up(max(f, hidden), LANE)       # lane-dense hidden width
    cp = _round_up(num_classes, LANE)          # lane-dense logits
    gp = _round_up(max(num_graphs, 1), 8)      # sublane-dense pooled rows
    n_pad, tr, tk = _choose_tiling(n)
    num_i, num_k = n_pad // tr, n_pad // tk

    # ---- graph-structure glue (XLA, outside the kernel) ----------------------------
    a_hat = build_normalized_adjacency(edge_index, n)
    a_hat = _pad2d(a_hat, n_pad, n_pad).astype(jnp.bfloat16)
    pool_mat = build_pool_matrix(batch, gp, n_pad)                   # (gp, n_pad) f32
    pool_blk = pool_mat.reshape(gp, num_i, tr).transpose(1, 0, 2)    # (num_i, gp, tr)

    x_pad = _pad2d(x, n_pad, hp).astype(jnp.bfloat16)
    w_stack = jnp.stack([_pad2d(params["w1"], hp, hp),
                         _pad2d(params["w2"], hp, hp),
                         _pad2d(params["w3"], hp, hp)]).astype(jnp.bfloat16)
    b_stack = jnp.stack([_pad2d(params["b1"][None, :], 1, hp),
                         _pad2d(params["b2"][None, :], 1, hp),
                         _pad2d(params["b3"][None, :], 1, hp)])
    w_lin = _pad2d(params["w_lin"], hp, cp)
    b_lin = _pad2d(params["b_lin"][None, :], 1, cp)

    # ---- VMEM budget & A_hat residency decision (clamped to physical VMEM) ---------
    phys_vmem = _physical_vmem_bytes()
    budget_cap = int(0.8 * phys_vmem)
    bytes_fixed = (
        2 * n_pad * hp * 2               # h + Z scratch (bf16)
        + tr * hp * 4 + gp * hp * 4      # row / pooled accumulators (f32)
        + 2 * tk * hp * 2                # x tiles (bf16, double-buffered)
        + 2 * (hp * hp * 2 + hp * 4)     # W_l (bf16) / b_l (f32) blocks
        + 2 * num_i * gp * tr * 4        # pool matrix (constant index)
        + 2 * (hp * cp * 4 + cp * 4)     # W_lin / b_lin
        + 2 * gp * cp * 4                # output block
    )
    bytes_resident = bytes_fixed + n_pad * n_pad * 2     # single-buffered A_hat
    bytes_streamed = bytes_fixed + 2 * tr * tk * 2       # double-buffered A tiles
    a_resident = bytes_resident + (8 << 20) <= budget_cap

    if a_resident:
        # Pre-block A_hat so every (i, k) tile is a contiguous leading-dim slice of the
        # VMEM-resident copy (copied HBM->VMEM exactly once inside the kernel).
        a_arg = (a_hat.reshape(num_i, tr, num_k, tk)
                 .transpose(0, 2, 1, 3).reshape(num_i * num_k, tr, tk))
        a_spec = pl.BlockSpec(memory_space=pl.ANY)
        a_scratch = [pltpu.VMEM((num_i * num_k, tr, tk), jnp.bfloat16)]
        vmem_need = bytes_resident
    else:
        # TODO(synk): on v7x, stream A_hat as fp8 (e4m3) to halve the dominant HBM
        # traffic; v5e/v6e would need an int8 quantization path instead.
        a_arg = a_hat
        a_spec = pl.BlockSpec((tr, tk), lambda l, i, k: (i, k))
        a_scratch = []
        vmem_need = bytes_streamed

    vmem_limit = int(min(max(vmem_need + (8 << 20), 32 << 20), budget_cap))

    # x is only consumed during the (layer 0, row-tile 0) sweep over k; afterwards the
    # block index collapses to 0 so the pipeline stops re-fetching it.
    def x_index_map(l, i, k):
        first = jnp.logical_and(l == 0, i == 0).astype(jnp.int32)
        return (k * first, 0)

    cost = pl.CostEstimate(
        flops=2 * NUM_LAYERS * n_pad * (n_pad + hp) * hp + 2 * gp * hp * (n_pad + cp),
        transcendentals=0,
        bytes_accessed=(1 if a_resident else NUM_LAYERS) * n_pad * n_pad * 2
        + n_pad * hp * 2 + NUM_LAYERS * (hp * hp * 2 + hp * 4)
        + num_i * gp * tr * 4 + (hp * cp + cp + gp * cp) * 4,
    )

    logits_padded = pl.pallas_call(
        functools.partial(_fused_gcn_kernel, a_resident=a_resident),
        out_shape=jax.ShapeDtypeStruct((gp, cp), jnp.float32),
        grid_spec=pltpu.PrefetchScalarGridSpec(
            num_scalar_prefetch=0,
            grid=(NUM_LAYERS, num_i, num_k),
            in_specs=[
                a_spec,                                                    # A_hat
                pl.BlockSpec((tk, hp), x_index_map),                       # x (layer 0 only)
                pl.BlockSpec((None, hp, hp), lambda l, i, k: (l, 0, 0)),   # W_l
                pl.BlockSpec((None, 1, hp), lambda l, i, k: (l, 0, 0)),    # b_l
                pl.BlockSpec((num_i, gp, tr), lambda l, i, k: (0, 0, 0)),  # pool matrix
                pl.BlockSpec((hp, cp), lambda l, i, k: (0, 0)),            # W_lin
                pl.BlockSpec((1, cp), lambda l, i, k: (0, 0)),             # b_lin
            ],
            out_specs=pl.BlockSpec((gp, cp), lambda l, i, k: (0, 0)),
            scratch_shapes=a_scratch + [
                pltpu.VMEM((n_pad, hp), jnp.bfloat16),   # h (hidden activation)
                pltpu.VMEM((n_pad, hp), jnp.bfloat16),   # Z = h @ W_l
                pltpu.VMEM((tr, hp), jnp.float32),       # row-tile accumulator
                pltpu.VMEM((gp, hp), jnp.float32),       # pooled accumulator
            ],
        ),
        compiler_params=pltpu.CompilerParams(
            # Cross-tile dependencies flow through VMEM scratch (h/Z/pooled).
            # TODO(synk): on v7x, split the row-tile axis across the 2 TensorCores
            # (core_map + VMEM_SHARED h/Z, core_barrier at layer boundaries).
            dimension_semantics=("arbitrary", "arbitrary", "arbitrary"),
            vmem_limit_bytes=vmem_limit,
        ),
        cost_estimate=cost,
    )(a_arg, x_pad, w_stack, b_stack, pool_blk, w_lin, b_lin)

    return logits_padded[:num_graphs, :num_classes]


# ---------------------------------------------------------------------------
# Main
# ---------------------------------------------------------------------------
if __name__ == "__main__":
    key = jax.random.PRNGKey(0)
    k_x, k_e0, k_e1 = jax.random.split(key, 3)

    num_nodes = 64
    num_graphs = 2
    num_node_features = 4
    hidden_channels = 32
    num_classes = 2

    # node features
    x = jax.random.normal(k_x, (num_nodes, num_node_features), dtype=jnp.float32)

    # deterministic random undirected edges, kept within each 32-node graph
    num_edges_per_graph = 96
    e0 = jax.random.randint(k_e0, (2, num_edges_per_graph), 0, 32)
    e1 = jax.random.randint(k_e1, (2, num_edges_per_graph), 0, 32) + 32
    src = jnp.concatenate([e0[0], e1[0]])
    dst = jnp.concatenate([e0[1], e1[1]])
    edge_index = jnp.stack(
        [jnp.concatenate([src, dst]), jnp.concatenate([dst, src])], axis=0)  # symmetric

    # batch assignment: first 32 nodes -> graph 0, last 32 -> graph 1
    batch = jnp.concatenate(
        [jnp.zeros((32,), jnp.int32), jnp.ones((32,), jnp.int32)])

    params = init_params(jax.random.PRNGKey(12345),
                         num_node_features, hidden_channels, num_classes)

    fwd = jax.jit(gcn_forward, static_argnames=("num_graphs",))
    logits = fwd(params, x, edge_index, batch, num_graphs=num_graphs)
    jax.block_until_ready(logits)
    assert logits.shape == (num_graphs, num_classes)

    # bf16 A_hat / Z / h make the aggregation path effectively bf16; check against a
    # pure-f32 JAX reference with a correspondingly loose relative bound.
    ref = gcn_reference(params, x, edge_index, batch, num_graphs)
    err = float(jnp.max(jnp.abs(logits - ref)))
    scale = float(jnp.maximum(jnp.max(jnp.abs(ref)), 1e-3))
    assert err / scale < 0.08, f"kernel vs f32 reference mismatch: err={err}, scale={scale}"

    print("KERNEL_OK")
</pallas_src>

<mosaic_0001>
module attributes {stable_mosaic.version = 11 : i64} {
  func.func @_fused_gcn_kernel(%arg0: i32, %arg1: i32, %arg2: i32, %arg3: memref<1x128x128xbf16, #tpu.memory_space<any>>, %arg4: memref<128x128xbf16, #tpu.memory_space<vmem>>, %arg5: memref<1x128x128xbf16, #tpu.memory_space<vmem>>, %arg6: memref<1x1x128xf32, #tpu.memory_space<vmem>>, %arg7: memref<1x8x128xf32, #tpu.memory_space<vmem>>, %arg8: memref<128x128xf32, #tpu.memory_space<vmem>>, %arg9: memref<1x128xf32, #tpu.memory_space<vmem>>, %arg10: memref<8x128xf32, #tpu.memory_space<vmem>>, %arg11: memref<1x128x128xbf16, #tpu.memory_space<vmem>>, %arg12: memref<128x128xbf16, #tpu.memory_space<vmem>>, %arg13: memref<128x128xbf16, #tpu.memory_space<vmem>>, %arg14: memref<128x128xf32, #tpu.memory_space<vmem>>, %arg15: memref<8x128xf32, #tpu.memory_space<vmem>>) attributes {dimension_semantics = [#tpu.dimension_semantics<arbitrary>, #tpu.dimension_semantics<arbitrary>, #tpu.dimension_semantics<arbitrary>], iteration_bounds = array<i64: 3, 1, 1>, scalar_prefetch = 0 : i64, scratch_operands = 5 : i64, tpu.core_type = #tpu.core_type<tc>, window_params = [{}, {transform_indices = @transform_1, window_bounds = array<i64: 128, 128>}, {transform_indices = @transform_2, window_bounds = array<i64: 1, 128, 128>}, {transform_indices = @transform_3, window_bounds = array<i64: 1, 1, 128>}, {pipeline_mode = #tpu.pipeline_mode<synchronous>, transform_indices = @transform_4, window_bounds = array<i64: 1, 8, 128>}, {pipeline_mode = #tpu.pipeline_mode<synchronous>, transform_indices = @transform_5, window_bounds = array<i64: 128, 128>}, {pipeline_mode = #tpu.pipeline_mode<synchronous>, transform_indices = @transform_6, window_bounds = array<i64: 1, 128>}, {pipeline_mode = #tpu.pipeline_mode<synchronous>, transform_indices = @transform_7, window_bounds = array<i64: 8, 128>}]} {
    %c0_i32 = arith.constant 0 : i32
    %0 = arith.cmpi eq, %arg0, %c0_i32 : i32
    %c0_i32_0 = arith.constant 0 : i32
    %1 = arith.cmpi eq, %arg1, %c0_i32_0 : i32
    %2 = arith.andi %0, %1 : i1
    %c0_i32_1 = arith.constant 0 : i32
    %3 = arith.cmpi eq, %arg2, %c0_i32_1 : i32
    %4 = arith.andi %2, %3 : i1
    %5 = arith.extui %4 : i1 to i32
    %c0_i32_2 = arith.constant 0 : i32
    %6 = arith.cmpi ne, %5, %c0_i32_2 : i32
    scf.if %6 {
      %cst = arith.constant 0.000000e+00 : f32
      %35 = vector.broadcast %cst : f32 to vector<8x128xf32>
      %c0_17 = arith.constant 0 : index
      %c0_18 = arith.constant 0 : index
      %36 = vector.load %arg15[%c0_17, %c0_18] : memref<8x128xf32, #tpu.memory_space<vmem>>, vector<8x128xf32>
      tpu.vector_store %arg15[%c0_17, %c0_18], %35 {strides = array<i32>} : memref<8x128xf32, #tpu.memory_space<vmem>>, vector<8x128xf32>,
      "tpu.region"() ({
        %37 = tpu.sem_alloc : memref<!tpu.dma_semaphore, #tpu.memory_space<semaphore_mem>>
        tpu.enqueue_dma source(%arg3 : memref<1x128x128xbf16, #tpu.memory_space<any>>) target(%arg11 : memref<1x128x128xbf16, #tpu.memory_space<vmem>>) target_semaphore(%37 : memref<!tpu.dma_semaphore, #tpu.memory_space<semaphore_mem>>)
        tpu.wait_dma2 semaphore(%37 : memref<!tpu.dma_semaphore, #tpu.memory_space<semaphore_mem>>) src(%arg3 : memref<1x128x128xbf16, #tpu.memory_space<any>>) dst(%arg11 : memref<1x128x128xbf16, #tpu.memory_space<vmem>>)
        tpu.yield
      }) : () -> ()
    } else {
    }
    %c128_i32 = arith.constant 128 : i32
    %7 = arith.muli %arg1, %c128_i32 : i32
    %8 = tpu.assume_multiple %7, 128 : i32
    %c128_i32_3 = arith.constant 128 : i32
    %9 = arith.muli %arg2, %c128_i32_3 : i32
    %10 = tpu.assume_multiple %9, 128 : i32
    %c1_i32 = arith.constant 1 : i32
    %11 = arith.muli %arg1, %c1_i32 : i32
    %12 = arith.addi %11, %arg2 : i32
    %13 = arith.index_cast %12 : i32 to index
    %c0 = arith.constant 0 : index
    %c0_4 = arith.constant 0 : index
    %14 = vector.load %arg11[%13, %c0, %c0_4] : memref<1x128x128xbf16, #tpu.memory_space<vmem>>, vector<1x128x128xbf16>
    %15 = vector.shape_cast %14 : vector<1x128x128xbf16> to vector<128x128xbf16>
    %c0_i32_5 = arith.constant 0 : i32
    %16 = arith.cmpi eq, %arg2, %c0_i32_5 : i32
    %17 = arith.extui %16 : i1 to i32
    %c0_i32_6 = arith.constant 0 : i32
    %18 = arith.cmpi ne, %17, %c0_i32_6 : i32
    scf.if %18 {
      %cst = arith.constant 0.000000e+00 : f32
      %35 = vector.broadcast %cst : f32 to vector<128x128xf32>
      %c0_17 = arith.constant 0 : index
      %c0_18 = arith.constant 0 : index
      %36 = vector.load %arg14[%c0_17, %c0_18] : memref<128x128xf32, #tpu.memory_space<vmem>>, vector<128x128xf32>
      tpu.vector_store %arg14[%c0_17, %c0_18], %35 {strides = array<i32>} : memref<128x128xf32, #tpu.memory_space<vmem>>, vector<128x128xf32>,
    } else {
    }
    %c0_i32_7 = arith.constant 0 : i32
    %19 = arith.cmpi eq, %arg1, %c0_i32_7 : i32
    %c0_i32_8 = arith.constant 0 : i32
    %20 = arith.cmpi eq, %arg0, %c0_i32_8 : i32
    %21 = arith.andi %19, %20 : i1
    %22 = arith.extui %21 : i1 to i32
    %c0_i32_9 = arith.constant 0 : i32
    %23 = arith.cmpi ne, %22, %c0_i32_9 : i32
    scf.if %23 {
      %c0_17 = arith.constant 0 : index
      %c0_18 = arith.constant 0 : index
      %35 = vector.load %arg4[%c0_17, %c0_18] : memref<128x128xbf16, #tpu.memory_space<vmem>>, vector<128x128xbf16>
      %c0_19 = arith.constant 0 : index
      %c0_20 = arith.constant 0 : index
      %c0_21 = arith.constant 0 : index
      %36 = vector.load %arg5[%c0_19, %c0_20, %c0_21] : memref<1x128x128xbf16, #tpu.memory_space<vmem>>, vector<1x128x128xbf16>
      %37 = vector.shape_cast %36 : vector<1x128x128xbf16> to vector<128x128xbf16>
      %cst = arith.constant dense<0.000000e+00> : vector<128x128xf32>
      %38 = tpu.matmul %35, %37, %cst {dimension_numbers = #tpu.dot_dimension_numbers<[1], [0], [0], [1], [0, 0, 1, 1], [], []>} : vector<128x128xbf16>, vector<128x128xbf16>, vector<128x128xf32> -> vector<128x128xf32>
      %39 = arith.truncf %38 : vector<128x128xf32> to vector<128x128xbf16>
      %40 = arith.index_cast %10 : i32 to index
      %c0_22 = arith.constant 0 : index
      %41 = vector.load %arg13[%40, %c0_22] : memref<128x128xbf16, #tpu.memory_space<vmem>>, vector<128x128xbf16>
      tpu.vector_store %arg13[%40, %c0_22], %39 {strides = array<i32>} : memref<128x128xbf16, #tpu.memory_space<vmem>>, vector<128x128xbf16>,
      %c0_23 = arith.constant 0 : index
      %c0_24 = arith.constant 0 : index
      %42 = vector.load %arg14[%c0_23, %c0_24] : memref<128x128xf32, #tpu.memory_space<vmem>>, vector<128x128xf32>
      %cst_25 = arith.constant dense<0.000000e+00> : vector<128x128xf32>
      %43 = tpu.matmul %15, %39, %cst_25 {dimension_numbers = #tpu.dot_dimension_numbers<[1], [0], [0], [1], [0, 0, 1, 1], [], []>} : vector<128x128xbf16>, vector<128x128xbf16>, vector<128x128xf32> -> vector<128x128xf32>
      %44 = arith.addf %42, %43 : vector<128x128xf32>
      %c0_26 = arith.constant 0 : index
      %c0_27 = arith.constant 0 : index
      %45 = vector.load %arg14[%c0_26, %c0_27] : memref<128x128xf32, #tpu.memory_space<vmem>>, vector<128x128xf32>
      tpu.vector_store %arg14[%c0_26, %c0_27], %44 {strides = array<i32>} : memref<128x128xf32, #tpu.memory_space<vmem>>, vector<128x128xf32>,
    } else {
    }
    %c0_i32_10 = arith.constant 0 : i32
    %24 = arith.cmpi eq, %arg1, %c0_i32_10 : i32
    %c0_i32_11 = arith.constant 0 : i32
    %25 = arith.cmpi sgt, %arg0, %c0_i32_11 : i32
    %26 = arith.andi %24, %25 : i1
    %27 = arith.extui %26 : i1 to i32
    %c0_i32_12 = arith.constant 0 : i32
    %28 = arith.cmpi ne, %27, %c0_i32_12 : i32
    scf.if %28 {
      %35 = arith.index_cast %10 : i32 to index
      %c0_17 = arith.constant 0 : index
      %36 = vector.load %arg12[%35, %c0_17] : memref<128x128xbf16, #tpu.memory_space<vmem>>, vector<128x128xbf16>
      %c0_18 = arith.constant 0 : index
      %c0_19 = arith.constant 0 : index
      %c0_20 = arith.constant 0 : index
      %37 = vector.load %arg5[%c0_18, %c0_19, %c0_20] : memref<1x128x128xbf16, #tpu.memory_space<vmem>>, vector<1x128x128xbf16>
      %38 = vector.shape_cast %37 : vector<1x128x128xbf16> to vector<128x128xbf16>
      %cst = arith.constant dense<0.000000e+00> : vector<128x128xf32>
      %39 = tpu.matmul %36, %38, %cst {dimension_numbers = #tpu.dot_dimension_numbers<[1], [0], [0], [1], [0, 0, 1, 1], [], []>} : vector<128x128xbf16>, vector<128x128xbf16>, vector<128x128xf32> -> vector<128x128xf32>
      %40 = arith.truncf %39 : vector<128x128xf32> to vector<128x128xbf16>
      %41 = arith.index_cast %10 : i32 to index
      %c0_21 = arith.constant 0 : index
      %42 = vector.load %arg13[%41, %c0_21] : memref<128x128xbf16, #tpu.memory_space<vmem>>, vector<128x128xbf16>
      tpu.vector_store %arg13[%41, %c0_21], %40 {strides = array<i32>} : memref<128x128xbf16, #tpu.memory_space<vmem>>, vector<128x128xbf16>,
      %c0_22 = arith.constant 0 : index
      %c0_23 = arith.constant 0 : index
      %43 = vector.load %arg14[%c0_22, %c0_23] : memref<128x128xf32, #tpu.memory_space<vmem>>, vector<128x128xf32>
      %cst_24 = arith.constant dense<0.000000e+00> : vector<128x128xf32>
      %44 = tpu.matmul %15, %40, %cst_24 {dimension_numbers = #tpu.dot_dimension_numbers<[1], [0], [0], [1], [0, 0, 1, 1], [], []>} : vector<128x128xbf16>, vector<128x128xbf16>, vector<128x128xf32> -> vector<128x128xf32>
      %45 = arith.addf %43, %44 : vector<128x128xf32>
      %c0_25 = arith.constant 0 : index
      %c0_26 = arith.constant 0 : index
      %46 = vector.load %arg14[%c0_25, %c0_26] : memref<128x128xf32, #tpu.memory_space<vmem>>, vector<128x128xf32>
      tpu.vector_store %arg14[%c0_25, %c0_26], %45 {strides = array<i32>} : memref<128x128xf32, #tpu.memory_space<vmem>>, vector<128x128xf32>,
    } else {
    }
    %c0_i32_13 = arith.constant 0 : i32
    %29 = arith.cmpi sgt, %arg1, %c0_i32_13 : i32
    %30 = arith.extui %29 : i1 to i32
    %c0_i32_14 = arith.constant 0 : i32
    %31 = arith.cmpi ne, %30, %c0_i32_14 : i32
    scf.if %31 {
      %c0_17 = arith.constant 0 : index
      %c0_18 = arith.constant 0 : index
      %35 = vector.load %arg14[%c0_17, %c0_18] : memref<128x128xf32, #tpu.memory_space<vmem>>, vector<128x128xf32>
      %36 = arith.index_cast %10 : i32 to index
      %c0_19 = arith.constant 0 : index
      %37 = vector.load %arg13[%36, %c0_19] : memref<128x128xbf16, #tpu.memory_space<vmem>>, vector<128x128xbf16>
      %cst = arith.constant dense<0.000000e+00> : vector<128x128xf32>
      %38 = tpu.matmul %15, %37, %cst {dimension_numbers = #tpu.dot_dimension_numbers<[1], [0], [0], [1], [0, 0, 1, 1], [], []>} : vector<128x128xbf16>, vector<128x128xbf16>, vector<128x128xf32> -> vector<128x128xf32>
      %39 = arith.addf %35, %38 : vector<128x128xf32>
      %c0_20 = arith.constant 0 : index
      %c0_21 = arith.constant 0 : index
      %40 = vector.load %arg14[%c0_20, %c0_21] : memref<128x128xf32, #tpu.memory_space<vmem>>, vector<128x128xf32>
      tpu.vector_store %arg14[%c0_20, %c0_21], %39 {strides = array<i32>} : memref<128x128xf32, #tpu.memory_space<vmem>>, vector<128x128xf32>,
    } else {
    }
    %c0_i32_15 = arith.constant 0 : i32
    %32 = arith.cmpi eq, %arg2, %c0_i32_15 : i32
    %33 = arith.extui %32 : i1 to i32
    %c0_i32_16 = arith.constant 0 : i32
    %34 = arith.cmpi ne, %33, %c0_i32_16 : i32
    scf.if %34 {
      %c0_17 = arith.constant 0 : index
      %c0_18 = arith.constant 0 : index
      %35 = vector.load %arg14[%c0_17, %c0_18] : memref<128x128xf32, #tpu.memory_space<vmem>>, vector<128x128xf32>
      %c0_19 = arith.constant 0 : index
      %c0_20 = arith.constant 0 : index
      %c0_21 = arith.constant 0 : index
      %36 = vector.load %arg6[%c0_19, %c0_20, %c0_21] : memref<1x1x128xf32, #tpu.memory_space<vmem>>, vector<1x1x128xf32>
      %37 = vector.shape_cast %36 : vector<1x1x128xf32> to vector<1x128xf32>
      %38 = vector.broadcast %37 : vector<1x128xf32> to vector<128x128xf32>
      %39 = arith.addf %35, %38 : vector<128x128xf32>
      %c2_i32 = arith.constant 2 : i32
      %40 = arith.cmpi slt, %arg0, %c2_i32 : i32
      %41 = arith.extui %40 : i1 to i32
      %c0_i32_22 = arith.constant 0 : i32
      %42 = arith.cmpi ne, %41, %c0_i32_22 : i32
      scf.if %42 {
        %cst = arith.constant 0.000000e+00 : f32
        %46 = vector.broadcast %cst : f32 to vector<128x128xf32>
        %47 = arith.maximumf %39, %46 : vector<128x128xf32>
        %48 = arith.truncf %47 : vector<128x128xf32> to vector<128x128xbf16>
        %49 = arith.index_cast %8 : i32 to index
        %c0_25 = arith.constant 0 : index
        %50 = vector.load %arg12[%49, %c0_25] : memref<128x128xbf16, #tpu.memory_space<vmem>>, vector<128x128xbf16>
        tpu.vector_store %arg12[%49, %c0_25], %48 {strides = array<i32>} : memref<128x128xbf16, #tpu.memory_space<vmem>>, vector<128x128xbf16>,
      } else {
      }
      %c2_i32_23 = arith.constant 2 : i32
      %43 = arith.cmpi eq, %arg0, %c2_i32_23 : i32
      %44 = arith.extui %43 : i1 to i32
      %c0_i32_24 = arith.constant 0 : i32
      %45 = arith.cmpi ne, %44, %c0_i32_24 : i32
      scf.if %45 {
        %c0_25 = arith.constant 0 : index
        %c0_26 = arith.constant 0 : index
        %46 = vector.load %arg15[%c0_25, %c0_26] : memref<8x128xf32, #tpu.memory_space<vmem>>, vector<8x128xf32>
        %47 = arith.index_cast %arg1 : i32 to index
        %c0_27 = arith.constant 0 : index
        %c0_28 = arith.constant 0 : index
        %48 = vector.load %arg7[%47, %c0_27, %c0_28] : memref<1x8x128xf32, #tpu.memory_space<vmem>>, vector<1x8x128xf32>
        %49 = vector.shape_cast %48 : vector<1x8x128xf32> to vector<8x128xf32>
        %cst = arith.constant dense<0.000000e+00> : vector<8x128xf32>
        %50 = tpu.matmul %49, %39, %cst {dimension_numbers = #tpu.dot_dimension_numbers<[1], [0], [0], [1], [0, 0, 1, 1], [], []>} : vector<8x128xf32>, vector<128x128xf32>, vector<8x128xf32> -> vector<8x128xf32>
        %51 = arith.addf %46, %50 : vector<8x128xf32>
        %c0_29 = arith.constant 0 : index
        %c0_30 = arith.constant 0 : index
        %52 = vector.load %arg15[%c0_29, %c0_30] : memref<8x128xf32, #tpu.memory_space<vmem>>, vector<8x128xf32>
        tpu.vector_store %arg15[%c0_29, %c0_30], %51 {strides = array<i32>} : memref<8x128xf32, #tpu.memory_space<vmem>>, vector<8x128xf32>,
        %c0_i32_31 = arith.constant 0 : i32
        %53 = arith.cmpi eq, %arg1, %c0_i32_31 : i32
        %54 = arith.extui %53 : i1 to i32
        %c0_i32_32 = arith.constant 0 : i32
        %55 = arith.cmpi ne, %54, %c0_i32_32 : i32
        scf.if %55 {
          %c0_33 = arith.constant 0 : index
          %c0_34 = arith.constant 0 : index
          %56 = vector.load %arg15[%c0_33, %c0_34] : memref<8x128xf32, #tpu.memory_space<vmem>>, vector<8x128xf32>
          %c0_35 = arith.constant 0 : index
          %c0_36 = arith.constant 0 : index
          %57 = vector.load %arg8[%c0_35, %c0_36] : memref<128x128xf32, #tpu.memory_space<vmem>>, vector<128x128xf32>
          %cst_37 = arith.constant dense<0.000000e+00> : vector<8x128xf32>
          %58 = tpu.matmul %56, %57, %cst_37 {dimension_numbers = #tpu.dot_dimension_numbers<[1], [0], [0], [1], [0, 0, 1, 1], [], []>} : vector<8x128xf32>, vector<128x128xf32>, vector<8x128xf32> -> vector<8x128xf32>
          %c0_38 = arith.constant 0 : index
          %c0_39 = arith.constant 0 : index
          %59 = vector.load %arg9[%c0_38, %c0_39] : memref<1x128xf32, #tpu.memory_space<vmem>>, vector<1x128xf32>
          %60 = vector.broadcast %59 : vector<1x128xf32> to vector<8x128xf32>
          %61 = arith.addf %58, %60 : vector<8x128xf32>
          %c0_40 = arith.constant 0 : index
          %c0_41 = arith.constant 0 : index
          %62 = vector.load %arg10[%c0_40, %c0_41] : memref<8x128xf32, #tpu.memory_space<vmem>>, vector<8x128xf32>
          tpu.vector_store %arg10[%c0_40, %c0_41], %61 {strides = array<i32>} : memref<8x128xf32, #tpu.memory_space<vmem>>, vector<8x128xf32>,
        } else {
        }
      } else {
      }
    } else {
    }
    return
  }
  func.func @transform_1(%arg0: i32, %arg1: i32, %arg2: i32) -> (i32, i32) {
    %c0_i32 = arith.constant 0 : i32
    %0 = arith.cmpi eq, %arg0, %c0_i32 : i32
    %c0_i32_0 = arith.constant 0 : i32
    %1 = arith.cmpi eq, %arg1, %c0_i32_0 : i32
    %2 = arith.andi %0, %1 : i1
    %3 = arith.extui %2 : i1 to i32
    %4 = arith.muli %arg2, %3 : i32
    %c0_i32_1 = arith.constant 0 : i32
    %c0_i32_2 = arith.constant 0 : i32
    return %4, %c0_i32_1 : i32, i32
  }
  func.func @transform_2(%arg0: i32, %arg1: i32, %arg2: i32) -> (i32, i32, i32) {
    %c0_i32 = arith.constant 0 : i32
    %c0_i32_0 = arith.constant 0 : i32
    %c0_i32_1 = arith.constant 0 : i32
    return %arg0, %c0_i32, %c0_i32_0 : i32, i32, i32
  }
  func.func @transform_3(%arg0: i32, %arg1: i32, %arg2: i32) -> (i32, i32, i32) {
    %c0_i32 = arith.constant 0 : i32
    %c0_i32_0 = arith.constant 0 : i32
    %c0_i32_1 = arith.constant 0 : i32
    return %arg0, %c0_i32, %c0_i32_0 : i32, i32, i32
  }
  func.func @transform_4(%arg0: i32, %arg1: i32, %arg2: i32) -> (i32, i32, i32) {
    %c0_i32 = arith.constant 0 : i32
    %c0_i32_0 = arith.constant 0 : i32
    %c0_i32_1 = arith.constant 0 : i32
    %c0_i32_2 = arith.constant 0 : i32
    return %c0_i32, %c0_i32_0, %c0_i32_1 : i32, i32, i32
  }
  func.func @transform_5(%arg0: i32, %arg1: i32, %arg2: i32) -> (i32, i32) {
    %c0_i32 = arith.constant 0 : i32
    %c0_i32_0 = arith.constant 0 : i32
    %c0_i32_1 = arith.constant 0 : i32
    return %c0_i32, %c0_i32_0 : i32, i32
  }
  func.func @transform_6(%arg0: i32, %arg1: i32, %arg2: i32) -> (i32, i32) {
    %c0_i32 = arith.constant 0 : i32
    %c0_i32_0 = arith.constant 0 : i32
    %c0_i32_1 = arith.constant 0 : i32
    return %c0_i32, %c0_i32_0 : i32, i32
  }
  func.func @transform_7(%arg0: i32, %arg1: i32, %arg2: i32) -> (i32, i32) {
    %c0_i32 = arith.constant 0 : i32
    %c0_i32_0 = arith.constant 0 : i32
    %c0_i32_1 = arith.constant 0 : i32
    return %c0_i32, %c0_i32_0 : i32, i32
  }
}

</mosaic_0001>

<bundles_post_ra>
// kernel: gcn_forward.1
= control target key start
LH: loop header
LB: loop body
LE: loop exit
PB: predicated region body
PF: predicated region fallthrough
CT: control target
= control target key end

     0   :  { %s2323_s24 = smov 0   ;;  %s2325_s25 = smov 0   ;;  %s2640_s0 = inlined_call_operand.vmem [shape: bf16[1,128,128], index: 0, kind: input, shape index: {}]   ;;  %s2641_s1 = inlined_call_operand.vmem [shape: bf16[128,128], index: 1, kind: input, shape index: {}]   ;;  %s2642_s2 = inlined_call_operand.vmem [shape: bf16[3,128,128], index: 2, kind: input, shape index: {}]   ;;  %s2643_s3 = inlined_call_operand.vmem [shape: f32[3,1,128], index: 3, kind: input, shape index: {}]   ;;  %s2644_s4 = inlined_call_operand.vmem [shape: f32[1,8,128], index: 4, kind: input, shape index: {}]   ;;  %s2645_s5 = inlined_call_operand.vmem [shape: f32[128,128], index: 5, kind: input, shape index: {}]   ;;  %s2646_s6 = inlined_call_operand.vmem [shape: f32[1,128], index: 6, kind: input, shape index: {}]   ;;  %s2647_s7 = inlined_call_operand.vmem [shape: f32[8,128], index: 7, kind: output, shape index: {}]  }
   0x1   :  { %s2327_s26 = smov 0  }
   0x2 LB: > { %s36_s27 = sadd.s32 1, %s2275_s25  ;;  %p1716_p0 = scmp.ge.s32.totalorder %s2279_s26, 1  ;;  %s2279_s26 = sphi %s2327_s26, %s17_s26   ;;  %s2275_s25 = sphi %s2325_s25, %s2649_s25   ;;  %s2271_s24 = sphi %s2323_s24, %s2648_s24  }
   0x3   : > { %p38_p1 = scmp.ge.s32.totalorder %s36_s27, 3  ;;  %p270_p2 = scmp.lt.s32.totalorder %s2279_s26, 4 }
   0x5   : > { %s2651_s27 = smov (%p38_p1, %s36_s27), 0  ;;  %p271_p3 = pnand %p1716_p0, %p270_p2 }
   0x6   : > { %p327_p4 = scmp.lt.s32.totalorder (!%p271_p3), %s2271_s24, 2  ;;  %p335_p5 = scmp.eq.s32.totalorder (!%p271_p3), %s2271_s24, 0 }
   0x7   : > { %274 = sbr.rel (%p271_p3) target bundleno = 1254 (0x4e6), region = 44 }
   0xc   : > { %s2346_s28 = scalar_select %p327_p4, %s2271_s24, 2  ;;  %v2281_v0 = vmov (%p335_p5), 0.0  }
   0xd   : > { %343 = sbr.rel (!%p335_p5) target bundleno = 30 (0x1e), region = 48  ;;  %344 = vst [vmem:[#allocation6] sm:$0xff] (%p335_p5), %v2281_v0 }
   0xe   : > { %s1986_s29 = sshll.u32 %s2346_s28, 6  ;;  %s334_s9 = scalar_lea.vmem %s2643_s3, %s2346_s28 }
   0xf   : > { %s2356_s12 = scalar_lea.vmem %s2642_s2, %s1986_s29 }
  0x12   : > { %v355_v1 = vld [vmem:[%s2640_s0] sm:$0xff]  ;;  %v357_v2 = vld [vmem:[%s2640_s0 + $0x8] sm:$0xff]  ;;  %v359_v3 = vld [vmem:[%s2640_s0 + $0x10] sm:$0xff] }
  0x13   : > { %356 = vst [vmem:[#allocation2 + $0x30] sm:$0xff] %v355_v1  ;;  %v361_v4 = vld [vmem:[%s2640_s0 + $0x18] sm:$0xff]  ;;  %v363_v5 = vld [vmem:[%s2640_s0 + $0x20] sm:$0xff]  ;;  %v365_v6 = vld [vmem:[%s2640_s0 + $0x28] sm:$0xff] }
  0x14   : > { %358 = vst [vmem:[#allocation2] sm:$0xff] %v357_v2  ;;  %v367_v7 = vld [vmem:[%s2640_s0 + $0x30] sm:$0xff]  ;;  %v369_v8 = vld [vmem:[%s2640_s0 + $0x38] sm:$0xff] }
  0x15   : > { %360 = vst [vmem:[#allocation2 + $0x18] sm:$0xff] %v359_v3 }
  0x16   : > { %362 = vst [vmem:[#allocation2 + $0x10] sm:$0xff] %v361_v4 }
  0x17   : > { %364 = vst [vmem:[#allocation2 + $0x8] sm:$0xff] %v363_v5 }
  0x18   : > { %366 = vst [vmem:[#allocation2 + $0x20] sm:$0xff] %v365_v6 }
  0x19   : > { %368 = vst [vmem:[#allocation2 + $0x28] sm:$0xff] %v367_v7 }
  0x1a   : > { %370 = vst [vmem:[#allocation2 + $0x38] sm:$0xff] %v369_v8 }
  0x1b   : > { %376 = vsyncadd [#allocation7], 1024 }
  0x1c   : > { %2267 = dma.done.wait [#allocation7], 1024 }
  0x1d   : > { %2268 = vsyncadd [#allocation7], 4294966272 }
  0x1e PF: > { %v2384_v9 = vld [vmem:[#allocation2 + $0x30] sm:$0xf]  ;;  %v2388_v11 = vld [vmem:[#allocation2 + $0x30] sm:$0xf0]  ;;  %v2392_v13 = vld [vmem:[#allocation2] sm:$0xf] }
  0x1f   : > { %v2386_v10 = vld [vmem:[#allocation2 + $0x30] sm:$0xf]  ;;  %v2390_v12 = vld [vmem:[#allocation2 + $0x30] sm:$0xf0]  ;;  %v2394_v14 = vld [vmem:[#allocation2] sm:$0xf] }
  0x20   : > { %v2396_v15 = vld [vmem:[#allocation2] sm:$0xf0]  ;;  %v2400_v17 = vld [vmem:[#allocation2 + $0x18] sm:$0xf]  ;;  %v2404_v19 = vld [vmem:[#allocation2 + $0x18] sm:$0xf0] }
  0x21   : > { %v2398_v16 = vld [vmem:[#allocation2] sm:$0xf0]  ;;  %v2402_v18 = vld [vmem:[#allocation2 + $0x18] sm:$0xf]  ;;  %v2406_v20 = vld [vmem:[#allocation2 + $0x18] sm:$0xf0] }
  0x22   : > { %v2408_v21 = vld [vmem:[#allocation2 + $0x10] sm:$0xf]  ;;  %v2412_v23 = vld [vmem:[#allocation2 + $0x10] sm:$0xf0]  ;;  %v2416_v25 = vld [vmem:[#allocation2 + $0x8] sm:$0xf] }
  0x23   : > { %v2410_v22 = vld [vmem:[#allocation2 + $0x10] sm:$0xf]  ;;  %v2414_v24 = vld [vmem:[#allocation2 + $0x10] sm:$0xf0]  ;;  %v2418_v26 = vld [vmem:[#allocation2 + $0x8] sm:$0xf] }
  0x24   : > { %v2420_v27 = vld [vmem:[#allocation2 + $0x8] sm:$0xf0]  ;;  %v2424_v29 = vld [vmem:[#allocation2 + $0x20] sm:$0xf]  ;;  %v2428_v31 = vld [vmem:[#allocation2 + $0x20] sm:$0xf0] }
  0x25   : > { %v2422_v28 = vld [vmem:[#allocation2 + $0x8] sm:$0xf0]  ;;  %v2426_v30 = vld [vmem:[#allocation2 + $0x20] sm:$0xf]  ;;  %v2430_v32 = vld [vmem:[#allocation2 + $0x20] sm:$0xf0] }
  0x26   : > { %v2432_v33 = vld [vmem:[#allocation2 + $0x28] sm:$0xf]  ;;  %v2436_v35 = vld [vmem:[#allocation2 + $0x28] sm:$0xf0]  ;;  %v2440_v37 = vld [vmem:[#allocation2 + $0x38] sm:$0xf] }
  0x27   : > { %v2434_v34 = vld [vmem:[#allocation2 + $0x28] sm:$0xf]  ;;  %v2438_v36 = vld [vmem:[#allocation2 + $0x28] sm:$0xf0]  ;;  %v2442_v38 = vld [vmem:[#allocation2 + $0x38] sm:$0xf] }
  0x28   : > { %v2444_v39 = vld [vmem:[#allocation2 + $0x38] sm:$0xf0]  ;;  %v2282_v41 = vmov 0.0   ;;  %v2027_v43 = vld [vmem:[%s2356_s12 + $0x30] sm:$0xff] (%p335_p5)  ;;  %v2026_v44 = vld [vmem:[%s2356_s12 + $0x28] sm:$0xff] (%p335_p5) }
  0x29   : > { %v2446_v40 = vld [vmem:[#allocation2 + $0x38] sm:$0xf0]  ;;  %407 = vst [vmem:[#allocation5 + $0x8] sm:$0xff] %v2282_v41  ;;  %v2025_v45 = vld [vmem:[%s2356_s12 + $0x20] sm:$0xff] (%p335_p5)  ;;  %v2023_v47 = vld [vmem:[%s2356_s12 + $0x10] sm:$0xff] (%p335_p5) }
  0x2a   : > { %408 = vst [vmem:[#allocation5 + $0x48] sm:$0xff] %v2282_v41  ;;  %v2028_v42 = vld [vmem:[%s2356_s12 + $0x38] sm:$0xff] (%p335_p5)  ;;  %v2022_v48 = vld [vmem:[%s2356_s12 + $0x8] sm:$0xff] (%p335_p5)  ;;  %v2021_v49 = vld [vmem:[%s2356_s12] sm:$0xff] (%p335_p5) }
  0x2b   : > { %409 = vst [vmem:[#allocation5 + $0x10] sm:$0xff] %v2282_v41  ;;  %2195 = vmatpush.bf16.msra.mxu2 (%p335_p5), %v2028_v42  ;;  %553 = vmatpush.bf16.msra.mxu0 (%p335_p5), %v2028_v42  ;;  %v2024_v46 = vld [vmem:[%s2356_s12 + $0x18] sm:$0xff] (%p335_p5)  ;;  %v2017_v50 = vld [vmem:[%s2641_s1 + $0x20] sm:$0xff] (%p335_p5)  ;;  %v2018_v52 = vld [vmem:[%s2641_s1 + $0x28] sm:$0xff] (%p335_p5) }
  0x2c   : > { %410 = vst [vmem:[#allocation5 + $0x20] sm:$0xff] %v2282_v41  ;;  %v2013_v51 = vld [vmem:[%s2641_s1] sm:$0xff] (%p335_p5)  ;;  %v2014_v53 = vld [vmem:[%s2641_s1 + $0x8] sm:$0xff] (%p335_p5)  ;;  %v2019_v54 = vld [vmem:[%s2641_s1 + $0x30] sm:$0xff] (%p335_p5) }
  0x2d   : > { %411 = vst [vmem:[#allocation5 + $0x50] sm:$0xff] %v2282_v41  ;;  %v2015_v55 = vld [vmem:[%s2641_s1 + $0x10] sm:$0xff] (%p335_p5)  ;;  %v2020_v56 = vld [vmem:[%s2641_s1 + $0x38] sm:$0xff] (%p335_p5) }
  0x2e   : > { %412 = vst [vmem:[#allocation5 + $0x18] sm:$0xff] %v2282_v41  ;;  %v2016_v57 = vld [vmem:[%s2641_s1 + $0x18] sm:$0xff] (%p335_p5) }
  0x2f   : > { %413 = vst [vmem:[#allocation5 + $0x60] sm:$0xff] %v2282_v41  ;;  %2196 = vmatpush.bf16.msra.mxu2 (%p335_p5), %v2027_v43  ;;  %554 = vmatpush.bf16.msra.mxu0 (%p335_p5), %v2027_v43 }
  0x30   : > { %414 = vst [vmem:[#allocation5 + $0x78] sm:$0xff] %v2282_v41 }
  0x31   : > { %415 = vst [vmem:[#allocation5 + $0x28] sm:$0xff] %v2282_v41 }
  0x32   : > { %416 = vst [vmem:[#allocation5 + $0x30] sm:$0xff] %v2282_v41 }
  0x33   : > { %417 = vst [vmem:[#allocation5 + $0x40] sm:$0xff] %v2282_v41  ;;  %2197 = vmatpush.bf16.msra.mxu2 (%p335_p5), %v2026_v44  ;;  %555 = vmatpush.bf16.msra.mxu0 (%p335_p5), %v2026_v44 }
  0x34   : > { %418 = vst [vmem:[#allocation5 + $0x68] sm:$0xff] %v2282_v41  ;;  %424 = sbr.rel (!%p335_p5) target bundleno = 490 (0x1ea), region = 76 }
  0x35   : > { %419 = vst [vmem:[#allocation5 + $0x58] sm:$0xff] %v2282_v41 }
  0x36   : > { %420 = vst [vmem:[#allocation5] sm:$0xff] %v2282_v41 }
  0x37   : > { %421 = vst [vmem:[#allocation5 + $0x38] sm:$0xff] %v2282_v41  ;;  %2198 = vmatpush.bf16.msra.mxu2 (%p335_p5), %v2025_v45  ;;  %556 = vmatpush.bf16.msra.mxu0 (%p335_p5), %v2025_v45 }
  0x38   : > { %422 = vst [vmem:[#allocation5 + $0x70] sm:$0xff] %v2282_v41 }
  0x3b   : > { %2199 = vmatpush.bf16.msra.mxu2 %v2024_v46  ;;  %557 = vmatpush.bf16.msra.mxu0 %v2024_v46 }
  0x3f   : > { %2200 = vmatpush.bf16.msra.mxu2 %v2023_v47  ;;  %558 = vmatpush.bf16.msra.mxu0 %v2023_v47 }
  0x43   : > { %2201 = vmatpush.bf16.msra.mxu2 %v2022_v48  ;;  %559 = vmatpush.bf16.msra.mxu0 %v2022_v48 }
  0x47   : > { %2202 = vmatpush.bf16.msra.mxu2 %v2021_v49  ;;  %560 = vmatpush.bf16.msra.mxu0 %v2021_v49 }
  0x4a   : > { %581 = vmatmul.bf16.vlgmr.msra.gmra.mxu2 %v2017_v50  ;;  %561 = vmatmul.bf16.vlgmr.msra.gmra.mxu0 %v2013_v51 }
  0x5a   : > { %586 = vmatmul.bf16.gmra.mxu2 %v2018_v52  ;;  %566 = vmatmul.bf16.gmra.mxu0 %v2014_v53 }
  0x6a   : > { %591 = vmatmul.bf16.gmra.mxu2 %v2019_v54  ;;  %571 = vmatmul.bf16.gmra.mxu0 %v2015_v55 }
  0x7a   : > { %596 = vmatmul.bf16.gmra.mxu2 %v2020_v56  ;;  %576 = vmatmul.bf16.gmra.mxu0 %v2016_v57 }
  0xc7   : > { %v562_v58 = vpop.f32.mrf.mxu0 }
  0xc8   : > { %v602_v59 = vpack.c.bf16 %v562_v58, %v562_v58 }
  0xca   : > { %v718_v62 = vunpack.c.l.b16 %v602_v59 }
  0xcd   : > { %v582_v60 = vpop.f32.mrf.mxu2 }
  0xcf   : > { %v564_v61 = vpop.f32.mrf.mxu0 }
  0xd0   : > { %v603_v63 = vpack.c.bf16 %v564_v61, %v564_v61 }
  0xd2   : > { %v719_v0 = vunpack.c.l.b16 %v603_v63 }
  0xd4   : > { %v2482_v1 = vpack.c.b16 %v719_v0, %v718_v62  ;;  %v610_v62 = vpack.c.bf16 %v582_v60, %v582_v60 }
  0xd5   : > { %v584_v2 = vpop.f32.mrf.mxu2 }
  0xd6   : > { %v611_v58 = vpack.c.bf16 %v584_v2, %v584_v2 }
  0xd7   : > { %v567_v3 = vpop.f32.mrf.mxu0 }
  0xd8   : > { %v727_v0 = vunpack.c.l.b16 %v611_v58  ;;  %v604_v2 = vpack.c.bf16 %v567_v3, %v567_v3  ;;  %v1805_v3 = vor.u32 %v2422_v28, %v2418_v26  ;;  %v1801_v26 = vor.u32 %v2414_v24, %v2410_v22  ;;  %v640_v22 = vld [vmem:[#allocation5 + $0x10] sm:$0xff] }
  0xd9   : > { %v1817_v28 = vor.u32 %v2446_v40, %v2442_v38  ;;  %v648_v40 = vld [vmem:[#allocation5 + $0x40] sm:$0xff] }
  0xdd   : > { %v587_v4 = vpop.f32.mrf.mxu2 }
  0xde   : > { %v612_v56 = vpack.c.bf16 %v587_v4, %v587_v4 }
  0xdf   : > { %v569_v5 = vpop.f32.mrf.mxu0 }
  0xe0   : > { %v728_v63 = vunpack.c.l.b16 %v612_v56 }
  0xe5   : > { %v589_v6 = vpop.f32.mrf.mxu2 }
  0xe6   : > { %v613_v53 = vpack.c.bf16 %v589_v6, %v589_v6 }
  0xe7   : > { %v572_v7 = vpop.f32.mrf.mxu0 }
  0xe8   : > { %v729_v59 = vunpack.c.l.b16 %v613_v53 }
  0xed   : > { %v592_v8 = vpop.f32.mrf.mxu2 }
  0xee   : > { %v614_v50 = vpack.c.bf16 %v592_v8, %v592_v8  ;;  %v739_v8 = vpack.c.b16 %v729_v59, %v728_v63  ;;  %v641_v59 = vld [vmem:[#allocation5 + $0x20] sm:$0xff] }
  0xef   : > { %v574_v41 = vpop.f32.mrf.mxu0 }
  0xf0   : > { %v730_v57 = vunpack.c.l.b16 %v614_v50  ;;  %v607_v4 = vpack.c.bf16 %v574_v41, %v574_v41  ;;  %v605_v50 = vpack.c.bf16 %v569_v5, %v569_v5  ;;  %v1793_v5 = vor.u32 %v2398_v16, %v2394_v14  ;;  %v638_v14 = vld [vmem:[#allocation5 + $0x8] sm:$0xff] }
  0xf1   : > { %v1809_v41 = vor.u32 %v2430_v32, %v2426_v30  ;;  %v646_v32 = vld [vmem:[#allocation5 + $0x28] sm:$0xff] }
  0xf5   : > { %v594_v42 = vpop.f32.mrf.mxu2 }
  0xf6   : > { %v615_v48 = vpack.c.bf16 %v594_v42, %v594_v42 }
  0xf7   : > { %v577_v43 = vpop.f32.mrf.mxu0 }
  0xf8   : > { %v731_v54 = vunpack.c.l.b16 %v615_v48  ;;  %v608_v42 = vpack.c.bf16 %v577_v43, %v577_v43  ;;  %v720_v43 = vunpack.c.l.b16 %v604_v2 }
  0xfa   : > { %v740_v61 = vpack.c.b16 %v731_v54, %v730_v57  ;;  %v724_v48 = vunpack.c.l.b16 %v608_v42 }
  0xfd   : > { %v597_v44 = vpop.f32.mrf.mxu2 }
  0xfe   : > { %v616_v46 = vpack.c.bf16 %v597_v44, %v597_v44 }
  0xff   : > { %v579_v45 = vpop.f32.mrf.mxu0 }
 0x100   : > { %v732_v51 = vunpack.c.l.b16 %v616_v46  ;;  %v609_v44 = vpack.c.bf16 %v579_v45, %v579_v45  ;;  %v726_v46 = vunpack.c.l.b16 %v610_v62  ;;  %v721_v45 = vunpack.c.l.b16 %v605_v50 }
 0x102   : > { %v738_v6 = vpack.c.b16 %v727_v0, %v726_v46  ;;  %v735_v54 = vpack.c.b16 %v721_v45, %v720_v43  ;;  %v649_v0 = vld [vmem:[#allocation5 + $0x68] sm:$0xff] }
 0x105   : > { %v599_v47 = vpop.f32.mrf.mxu2 }
 0x106   : > { %v617_v49 = vpack.c.bf16 %v599_v47, %v599_v47  ;;  %v606_v47 = vpack.c.bf16 %v572_v7, %v572_v7  ;;  %v1789_v7 = vor.u32 %v2390_v12, %v2386_v10  ;;  %v1797_v10 = vor.u32 %v2406_v20, %v2402_v18  ;;  %v639_v18 = vld [vmem:[#allocation5 + $0x48] sm:$0xff] }
 0x107   : > { %v1813_v12 = vor.u32 %v2438_v36, %v2434_v34  ;;  %v647_v36 = vld [vmem:[#allocation5 + $0x30] sm:$0xff] }
 0x108   : > { %v733_v52 = vunpack.c.l.b16 %v617_v49  ;;  %v725_v49 = vunpack.c.l.b16 %v609_v44  ;;  %v722_v60 = vunpack.c.l.b16 %v606_v47  ;;  %v642_v44 = vld [vmem:[#allocation5 + $0x50] sm:$0xff]  ;;  %v650_v47 = vld [vmem:[#allocation5 + $0x58] sm:$0xff] }
 0x10a   : > { %v741_v55 = vpack.c.b16 %v733_v52, %v732_v51  ;;  %v723_v51 = vunpack.c.l.b16 %v607_v4  ;;  %v737_v52 = vpack.c.b16 %v725_v49, %v724_v48  ;;  %v643_v48 = vld [vmem:[#allocation5 + $0x18] sm:$0xff] }
 0x10c   : > { %750 = vmatpush.bf16.msra.mxu1 %v741_v55  ;;  %2203 = vmatpush.bf16.msra.mxu3 %v741_v55  ;;  %v736_v53 = vpack.c.b16 %v723_v51, %v722_v60  ;;  %v651_v60 = vld [vmem:[#allocation5] sm:$0xff] }
 0x110   : > { %751 = vmatpush.bf16.msra.mxu1 %v740_v61  ;;  %2204 = vmatpush.bf16.msra.mxu3 %v740_v61 }
 0x114   : > { %752 = vmatpush.bf16.msra.mxu1 %v739_v8  ;;  %2205 = vmatpush.bf16.msra.mxu3 %v739_v8 }
 0x118   : > { %753 = vmatpush.bf16.msra.mxu1 %v738_v6  ;;  %2206 = vmatpush.bf16.msra.mxu3 %v738_v6 }
 0x11c   : > { %754 = vmatpush.bf16.msra.mxu1 %v737_v52  ;;  %2207 = vmatpush.bf16.msra.mxu3 %v737_v52  ;;  %v644_v52 = vld [vmem:[#allocation5 + $0x60] sm:$0xff] }
 0x120   : > { %755 = vmatpush.bf16.msra.mxu1 %v736_v53  ;;  %2208 = vmatpush.bf16.msra.mxu3 %v736_v53 }
 0x124   : > { %756 = vmatpush.bf16.msra.mxu1 %v735_v54  ;;  %2209 = vmatpush.bf16.msra.mxu3 %v735_v54  ;;  %v652_v54 = vld [vmem:[#allocation5 + $0x38] sm:$0xff] }
 0x128   : > { %757 = vmatpush.bf16.msra.mxu1 %v2482_v1  ;;  %2210 = vmatpush.bf16.msra.mxu3 %v2482_v1 }
 0x12b   : > { %758 = vmatmul.bf16.vlgmr.msra.gmra.mxu1 %v1789_v7  ;;  %778 = vmatmul.bf16.vlgmr.msra.gmra.mxu3 %v1805_v3  ;;  %v645_v3 = vld [vmem:[#allocation5 + $0x78] sm:$0xff] }
 0x13b   : > { %763 = vmatmul.bf16.gmra.mxu1 %v1793_v5  ;;  %783 = vmatmul.bf16.gmra.mxu3 %v1809_v41 }
 0x14b   : > { %768 = vmatmul.bf16.gmra.mxu1 %v1797_v10  ;;  %788 = vmatmul.bf16.gmra.mxu3 %v1813_v12  ;;  %v653_v12 = vld [vmem:[#allocation5 + $0x70] sm:$0xff] }
 0x15b   : > { %773 = vmatmul.bf16.gmra.mxu1 %v1801_v26  ;;  %793 = vmatmul.bf16.gmra.mxu3 %v1817_v28 }
 0x1a8   : > { %v759_v16 = vpop.f32.mrf.mxu1 }
 0x1a9   : > { %v799_v30 = vadd.f32 %v759_v16, %v638_v14 }
 0x1ab   : > { %815 = vst [vmem:[#allocation5 + $0x8] sm:$0xff] %v799_v30 }
 0x1ae   : > { %v779_v1 = vpop.f32.mrf.mxu3 }
 0x1af   : > { %v807_v20 = vadd.f32 %v779_v1, %v646_v32 }
 0x1b0   : > { %v761_v55 = vpop.f32.mrf.mxu1 }
 0x1b1   : > { %823 = vst [vmem:[#allocation5 + $0x28] sm:$0xff] %v807_v20  ;;  %v800_v34 = vadd.f32 %v761_v55, %v639_v18 }
 0x1b3   : > { %816 = vst [vmem:[#allocation5 + $0x48] sm:$0xff] %v800_v34 }
 0x1b6   : > { %v781_v56 = vpop.f32.mrf.mxu3 }
 0x1b7   : > { %v808_v24 = vadd.f32 %v781_v56, %v647_v36 }
 0x1b8   : > { %v764_v57 = vpop.f32.mrf.mxu1 }
 0x1b9   : > { %824 = vst [vmem:[#allocation5 + $0x30] sm:$0xff] %v808_v24  ;;  %v801_v38 = vadd.f32 %v764_v57, %v640_v22 }
 0x1bb   : > { %817 = vst [vmem:[#allocation5 + $0x10] sm:$0xff] %v801_v38 }
 0x1be   : > { %v784_v58 = vpop.f32.mrf.mxu3 }
 0x1bf   : > { %v809_v61 = vadd.f32 %v784_v58, %v648_v40 }
 0x1c0   : > { %v766_v62 = vpop.f32.mrf.mxu1 }
 0x1c1   : > { %825 = vst [vmem:[#allocation5 + $0x40] sm:$0xff] %v809_v61  ;;  %v802_v63 = vadd.f32 %v766_v62, %v641_v59 }
 0x1c3   : > { %818 = vst [vmem:[#allocation5 + $0x20] sm:$0xff] %v802_v63 }
 0x1c6   : > { %v786_v42 = vpop.f32.mrf.mxu3 }
 0x1c7   : > { %v810_v8 = vadd.f32 %v786_v42, %v649_v0 }
 0x1c8   : > { %v769_v46 = vpop.f32.mrf.mxu1 }
 0x1c9   : > { %826 = vst [vmem:[#allocation5 + $0x68] sm:$0xff] %v810_v8  ;;  %v803_v6 = vadd.f32 %v769_v46, %v642_v44 }
 0x1cb   : > { %819 = vst [vmem:[#allocation5 + $0x50] sm:$0xff] %v803_v6 }
 0x1ce   : > { %v789_v4 = vpop.f32.mrf.mxu3 }
 0x1cf   : > { %v811_v49 = vadd.f32 %v789_v4, %v650_v47 }
 0x1d0   : > { %v771_v2 = vpop.f32.mrf.mxu1 }
 0x1d1   : > { %827 = vst [vmem:[#allocation5 + $0x58] sm:$0xff] %v811_v49  ;;  %v804_v50 = vadd.f32 %v771_v2, %v643_v48 }
 0x1d3   : > { %820 = vst [vmem:[#allocation5 + $0x18] sm:$0xff] %v804_v50 }
 0x1d6   : > { %v791_v51 = vpop.f32.mrf.mxu3 }
 0x1d7   : > { %v812_v43 = vadd.f32 %v791_v51, %v651_v60 }
 0x1d8   : > { %v774_v45 = vpop.f32.mrf.mxu1 }
 0x1d9   : > { %828 = vst [vmem:[#allocation5] sm:$0xff] %v812_v43  ;;  %v805_v53 = vadd.f32 %v774_v45, %v644_v52 }
 0x1db   : > { %821 = vst [vmem:[#allocation5 + $0x60] sm:$0xff] %v805_v53 }
 0x1de   : > { %v794_v7 = vpop.f32.mrf.mxu3 }
 0x1df   : > { %v813_v5 = vadd.f32 %v794_v7, %v652_v54 }
 0x1e0   : > { %v776_v41 = vpop.f32.mrf.mxu1 }
 0x1e1   : > { %829 = vst [vmem:[#allocation5 + $0x38] sm:$0xff] %v813_v5  ;;  %v806_v10 = vadd.f32 %v776_v41, %v645_v3 }
 0x1e3   : > { %822 = vst [vmem:[#allocation5 + $0x78] sm:$0xff] %v806_v10 }
 0x1e6   : > { %v796_v26 = vpop.f32.mrf.mxu3 }
 0x1e7   : > { %v814_v28 = vadd.f32 %v796_v26, %v653_v12 }
 0x1e9   : > { %830 = vst [vmem:[#allocation5 + $0x70] sm:$0xff] %v814_v28 }
 0x1ea PF: > { %p831_p6 = scmp.gt.s32.totalorder %s2271_s24, 0 }
 0x1eb   : > { %v2045_v14 = vld [vmem:[%s2356_s12 + $0x38] sm:$0xff] (%p831_p6)  ;;  %v2044_v16 = vld [vmem:[%s2356_s12 + $0x30] sm:$0xff] (%p831_p6)  ;;  %v2043_v30 = vld [vmem:[%s2356_s12 + $0x28] sm:$0xff] (%p831_p6) }
 0x1ec   : > { %835 = sbr.rel (!%p831_p6) target bundleno = 939 (0x3ab), region = 80  ;;  %2211 = vmatpush.bf16.msra.mxu2 (%p831_p6), %v2045_v14  ;;  %968 = vmatpush.bf16.msra.mxu0 (%p831_p6), %v2045_v14  ;;  %v2042_v32 = vld [vmem:[%s2356_s12 + $0x20] sm:$0xff] (%p831_p6)  ;;  %v2041_v1 = vld [vmem:[%s2356_s12 + $0x18] sm:$0xff] (%p831_p6)  ;;  %v2040_v18 = vld [vmem:[%s2356_s12 + $0x10] sm:$0xff] (%p831_p6) }
 0x1ed   : > { %v2039_v20 = vld [vmem:[%s2356_s12 + $0x8] sm:$0xff] (%p831_p6)  ;;  %v2038_v55 = vld [vmem:[%s2356_s12] sm:$0xff] (%p831_p6)  ;;  %v2031_v22 = vld [vmem:[#allocation3 + $0x18] sm:$0xff] (%p831_p6) }
 0x1ee   : > { %v2034_v34 = vld [vmem:[#allocation3 + $0x28] sm:$0xff] (%p831_p6)  ;;  %v2030_v36 = vld [vmem:[#allocation3] sm:$0xff] (%p831_p6)  ;;  %v2036_v24 = vld [vmem:[#allocation3 + $0x30] sm:$0xff] (%p831_p6) }
 0x1ef   : > { %v2035_v56 = vld [vmem:[#allocation3 + $0x8] sm:$0xff] (%p831_p6)  ;;  %v2032_v57 = vld [vmem:[#allocation3 + $0x10] sm:$0xff] (%p831_p6)  ;;  %v2037_v38 = vld [vmem:[#allocation3 + $0x38] sm:$0xff] (%p831_p6) }
 0x1f0   : > { %2212 = vmatpush.bf16.msra.mxu2 (%p831_p6), %v2044_v16  ;;  %969 = vmatpush.bf16.msra.mxu0 (%p831_p6), %v2044_v16  ;;  %v2033_v40 = vld [vmem:[#allocation3 + $0x20] sm:$0xff] (%p831_p6) }
 0x1f4   : > { %2213 = vmatpush.bf16.msra.mxu2 %v2043_v30  ;;  %970 = vmatpush.bf16.msra.mxu0 %v2043_v30 }
 0x1f8   : > { %2214 = vmatpush.bf16.msra.mxu2 %v2042_v32  ;;  %971 = vmatpush.bf16.msra.mxu0 %v2042_v32 }
 0x1fc   : > { %2215 = vmatpush.bf16.msra.mxu2 %v2041_v1  ;;  %972 = vmatpush.bf16.msra.mxu0 %v2041_v1 }
 0x200   : > { %2216 = vmatpush.bf16.msra.mxu2 %v2040_v18  ;;  %973 = vmatpush.bf16.msra.mxu0 %v2040_v18 }
 0x204   : > { %2217 = vmatpush.bf16.msra.mxu2 %v2039_v20  ;;  %974 = vmatpush.bf16.msra.mxu0 %v2039_v20 }
 0x208   : > { %2218 = vmatpush.bf16.msra.mxu2 %v2038_v55  ;;  %975 = vmatpush.bf16.msra.mxu0 %v2038_v55 }
 0x20b   : > { %996 = vmatmul.bf16.vlgmr.msra.gmra.mxu2 %v2034_v34  ;;  %976 = vmatmul.bf16.vlgmr.msra.gmra.mxu0 %v2030_v36 }
 0x21b   : > { %1001 = vmatmul.bf16.gmra.mxu2 %v2035_v56  ;;  %981 = vmatmul.bf16.gmra.mxu0 %v2031_v22 }
 0x22b   : > { %1006 = vmatmul.bf16.gmra.mxu2 %v2036_v24  ;;  %986 = vmatmul.bf16.gmra.mxu0 %v2032_v57 }
 0x23b   : > { %1011 = vmatmul.bf16.gmra.mxu2 %v2037_v38  ;;  %991 = vmatmul.bf16.gmra.mxu0 %v2033_v40 }
 0x288   : > { %v977_v58 = vpop.f32.mrf.mxu0 }
 0x289   : > { %v1017_v59 = vpack.c.bf16 %v977_v58, %v977_v58 }
 0x28b   : > { %v1131_v63 = vunpack.c.l.b16 %v1017_v59 }
 0x28e   : > { %v997_v61 = vpop.f32.mrf.mxu2 }
 0x28f   : > { %v1025_v32 = vpack.c.bf16 %v997_v61, %v997_v61 }
 0x290   : > { %v979_v62 = vpop.f32.mrf.mxu0 }
 0x291   : > { %v1018_v0 = vpack.c.bf16 %v979_v62, %v979_v62  ;;  %v1139_v36 = vunpack.c.l.b16 %v1025_v32  ;;  %v1057_v32 = vld [vmem:[#allocation5 + $0x60] sm:$0xff] }
 0x293   : > { %v1132_v42 = vunpack.c.l.b16 %v1018_v0 }
 0x295   : > { %v2511_v44 = vpack.c.b16 %v1132_v42, %v1131_v63 }
 0x296   : > { %v999_v8 = vpop.f32.mrf.mxu2 }
 0x297   : > { %v1026_v14 = vpack.c.bf16 %v999_v8, %v999_v8 }
 0x298   : > { %v982_v46 = vpop.f32.mrf.mxu0 }
 0x299   : > { %v1140_v18 = vunpack.c.l.b16 %v1026_v14  ;;  %v1019_v40 = vpack.c.bf16 %v982_v46, %v982_v46  ;;  %v1902_v46 = vor.u32 %v2420_v27, %v2416_v25  ;;  %v1898_v25 = vor.u32 %v2412_v23, %v2408_v21  ;;  %v1053_v21 = vld [vmem:[#allocation5 + $0x10] sm:$0xff] }
 0x29a   : > { %v1914_v27 = vor.u32 %v2444_v39, %v2440_v37  ;;  %v1061_v39 = vld [vmem:[#allocation5 + $0x40] sm:$0xff] }
 0x29b   : > { %v1151_v56 = vpack.c.b16 %v1140_v18, %v1139_v36  ;;  %v1133_v63 = vunpack.c.l.b16 %v1019_v40  ;;  %v1058_v36 = vld [vmem:[#allocation5 + $0x78] sm:$0xff] }
 0x29e   : > { %v1002_v6 = vpop.f32.mrf.mxu2 }
 0x29f   : > { %v1027_v26 = vpack.c.bf16 %v1002_v6, %v1002_v6  ;;  %v1886_v6 = vor.u32 %v2388_v11, %v2384_v9  ;;  %v1894_v9 = vor.u32 %v2404_v19, %v2400_v17  ;;  %v1910_v11 = vor.u32 %v2436_v35, %v2432_v33  ;;  %v1052_v17 = vld [vmem:[#allocation5 + $0x48] sm:$0xff]  ;;  %v1060_v35 = vld [vmem:[#allocation5 + $0x30] sm:$0xff] }
 0x2a0   : > { %v984_v47 = vpop.f32.mrf.mxu0 }
 0x2a1   : > { %v1141_v1 = vunpack.c.l.b16 %v1027_v26  ;;  %v1020_v58 = vpack.c.bf16 %v984_v47, %v984_v47  ;;  %v1890_v47 = vor.u32 %v2396_v15, %v2392_v13  ;;  %v1051_v13 = vld [vmem:[#allocation5 + $0x8] sm:$0xff] }
 0x2a3   : > { %v1134_v0 = vunpack.c.l.b16 %v1020_v58 }
 0x2a5   : > { %v1148_v8 = vpack.c.b16 %v1134_v0, %v1133_v63 }
 0x2a6   : > { %v1004_v4 = vpop.f32.mrf.mxu2 }
 0x2a7   : > { %v1028_v41 = vpack.c.bf16 %v1004_v4, %v1004_v4  ;;  %v1906_v4 = vor.u32 %v2428_v31, %v2424_v29  ;;  %v1059_v31 = vld [vmem:[#allocation5 + $0x28] sm:$0xff] }
 0x2a8   : > { %v987_v48 = vpop.f32.mrf.mxu0 }
 0x2a9   : > { %v1142_v16 = vunpack.c.l.b16 %v1028_v41  ;;  %v1021_v22 = vpack.c.bf16 %v987_v48, %v987_v48  ;;  %v1063_v41 = vld [vmem:[#allocation5 + $0x58] sm:$0xff] }
 0x2ab   : > { %v1152_v34 = vpack.c.b16 %v1142_v16, %v1141_v1  ;;  %v1135_v59 = vunpack.c.l.b16 %v1021_v22  ;;  %v1064_v16 = vld [vmem:[#allocation5] sm:$0xff] }
 0x2ae   : > { %v1007_v49 = vpop.f32.mrf.mxu2 }
 0x2af   : > { %v1029_v7 = vpack.c.bf16 %v1007_v49, %v1007_v49 }
 0x2b0   : > { %v989_v2 = vpop.f32.mrf.mxu0 }
 0x2b1   : > { %v1143_v28 = vunpack.c.l.b16 %v1029_v7  ;;  %v1022_v24 = vpack.c.bf16 %v989_v2, %v989_v2 }
 0x2b3   : > { %v1136_v61 = vunpack.c.l.b16 %v1022_v24 }
 0x2b5   : > { %v1149_v42 = vpack.c.b16 %v1136_v61, %v1135_v59 }
 0x2b6   : > { %v1009_v50 = vpop.f32.mrf.mxu2 }
 0x2b7   : > { %v1030_v53 = vpack.c.bf16 %v1009_v50, %v1009_v50 }
 0x2b8   : > { %v992_v60 = vpop.f32.mrf.mxu0 }
 0x2b9   : > { %v1144_v10 = vunpack.c.l.b16 %v1030_v53  ;;  %v1023_v20 = vpack.c.bf16 %v992_v60, %v992_v60  ;;  %v1054_v60 = vld [vmem:[#allocation5 + $0x20] sm:$0xff] }
 0x2bb   : > { %v1153_v30 = vpack.c.b16 %v1144_v10, %v1143_v28  ;;  %v1137_v57 = vunpack.c.l.b16 %v1023_v20 }
 0x2be   : > { %v1012_v51 = vpop.f32.mrf.mxu2 }
 0x2bf   : > { %v1031_v43 = vpack.c.bf16 %v1012_v51, %v1012_v51 }
 0x2c0   : > { %v994_v52 = vpop.f32.mrf.mxu0 }
 0x2c1   : > { %v1145_v3 = vunpack.c.l.b16 %v1031_v43  ;;  %v1024_v55 = vpack.c.bf16 %v994_v52, %v994_v52 }
 0x2c3   : > { %v1138_v38 = vunpack.c.l.b16 %v1024_v55  ;;  %v1065_v55 = vld [vmem:[#allocation5 + $0x38] sm:$0xff] }
 0x2c5   : > { %v1150_v62 = vpack.c.b16 %v1138_v38, %v1137_v57  ;;  %v1066_v57 = vld [vmem:[#allocation5 + $0x70] sm:$0xff] }
 0x2c6   : > { %v1014_v45 = vpop.f32.mrf.mxu2 }
 0x2c7   : > { %v1032_v54 = vpack.c.bf16 %v1014_v45, %v1014_v45  ;;  %v1062_v45 = vld [vmem:[#allocation5 + $0x68] sm:$0xff] }
 0x2c9   : > { %v1146_v5 = vunpack.c.l.b16 %v1032_v54  ;;  %v1055_v54 = vld [vmem:[#allocation5 + $0x50] sm:$0xff] }
 0x2cb   : > { %v1154_v12 = vpack.c.b16 %v1146_v5, %v1145_v3 }
 0x2cd   : > { %1163 = vmatpush.bf16.msra.mxu1 %v1154_v12  ;;  %2219 = vmatpush.bf16.msra.mxu3 %v1154_v12  ;;  %v1056_v12 = vld [vmem:[#allocation5 + $0x18] sm:$0xff] }
 0x2d1   : > { %1164 = vmatpush.bf16.msra.mxu1 %v1153_v30  ;;  %2220 = vmatpush.bf16.msra.mxu3 %v1153_v30 }
 0x2d5   : > { %1165 = vmatpush.bf16.msra.mxu1 %v1152_v34  ;;  %2221 = vmatpush.bf16.msra.mxu3 %v1152_v34 }
 0x2d9   : > { %1166 = vmatpush.bf16.msra.mxu1 %v1151_v56  ;;  %2222 = vmatpush.bf16.msra.mxu3 %v1151_v56 }
 0x2dd   : > { %1167 = vmatpush.bf16.msra.mxu1 %v1150_v62  ;;  %2223 = vmatpush.bf16.msra.mxu3 %v1150_v62 }
 0x2e1   : > { %1168 = vmatpush.bf16.msra.mxu1 %v1149_v42  ;;  %2224 = vmatpush.bf16.msra.mxu3 %v1149_v42 }
 0x2e5   : > { %1169 = vmatpush.bf16.msra.mxu1 %v1148_v8  ;;  %2225 = vmatpush.bf16.msra.mxu3 %v1148_v8 }
 0x2e9   : > { %1170 = vmatpush.bf16.msra.mxu1 %v2511_v44  ;;  %2226 = vmatpush.bf16.msra.mxu3 %v2511_v44 }
 0x2ec   : > { %1171 = vmatmul.bf16.vlgmr.msra.gmra.mxu1 %v1886_v6  ;;  %1191 = vmatmul.bf16.vlgmr.msra.gmra.mxu3 %v1902_v46 }
 0x2fc   : > { %1176 = vmatmul.bf16.gmra.mxu1 %v1890_v47  ;;  %1196 = vmatmul.bf16.gmra.mxu3 %v1906_v4 }
 0x30c   : > { %1181 = vmatmul.bf16.gmra.mxu1 %v1894_v9  ;;  %1201 = vmatmul.bf16.gmra.mxu3 %v1910_v11 }
 0x31c   : > { %1186 = vmatmul.bf16.gmra.mxu1 %v1898_v25  ;;  %1206 = vmatmul.bf16.gmra.mxu3 %v1914_v27 }
 0x369   : > { %v1172_v15 = vpop.f32.mrf.mxu1 }
 0x36a   : > { %v1212_v29 = vadd.f32 %v1172_v15, %v1051_v13 }
 0x36c   : > { %1228 = vst [vmem:[#allocation5 + $0x8] sm:$0xff] %v1212_v29 }
 0x36f   : > { %v1192_v44 = vpop.f32.mrf.mxu3 }
 0x370   : > { %v1220_v19 = vadd.f32 %v1192_v44, %v1059_v31 }
 0x371   : > { %v1174_v48 = vpop.f32.mrf.mxu1 }
 0x372   : > { %1236 = vst [vmem:[#allocation5 + $0x28] sm:$0xff] %v1220_v19  ;;  %v1213_v33 = vadd.f32 %v1174_v48, %v1052_v17 }
 0x374   : > { %1229 = vst [vmem:[#allocation5 + $0x48] sm:$0xff] %v1213_v33 }
 0x377   : > { %v1194_v49 = vpop.f32.mrf.mxu3 }
 0x378   : > { %v1221_v23 = vadd.f32 %v1194_v49, %v1060_v35 }
 0x379   : > { %v1177_v2 = vpop.f32.mrf.mxu1 }
 0x37a   : > { %1237 = vst [vmem:[#allocation5 + $0x30] sm:$0xff] %v1221_v23  ;;  %v1214_v37 = vadd.f32 %v1177_v2, %v1053_v21 }
 0x37c   : > { %1230 = vst [vmem:[#allocation5 + $0x10] sm:$0xff] %v1214_v37 }
 0x37f   : > { %v1197_v50 = vpop.f32.mrf.mxu3 }
 0x380   : > { %v1222_v51 = vadd.f32 %v1197_v50, %v1061_v39 }
 0x381   : > { %v1179_v52 = vpop.f32.mrf.mxu1 }
 0x382   : > { %1238 = vst [vmem:[#allocation5 + $0x40] sm:$0xff] %v1222_v51  ;;  %v1215_v43 = vadd.f32 %v1179_v52, %v1054_v60 }
 0x384   : > { %1231 = vst [vmem:[#allocation5 + $0x20] sm:$0xff] %v1215_v43 }
 0x387   : > { %v1199_v53 = vpop.f32.mrf.mxu3 }
 0x388   : > { %v1223_v7 = vadd.f32 %v1199_v53, %v1062_v45 }
 0x389   : > { %v1182_v3 = vpop.f32.mrf.mxu1 }
 0x38a   : > { %1239 = vst [vmem:[#allocation5 + $0x68] sm:$0xff] %v1223_v7  ;;  %v1216_v5 = vadd.f32 %v1182_v3, %v1055_v54 }
 0x38c   : > { %1232 = vst [vmem:[#allocation5 + $0x50] sm:$0xff] %v1216_v5 }
 0x38f   : > { %v1202_v10 = vpop.f32.mrf.mxu3 }
 0x390   : > { %v1224_v26 = vadd.f32 %v1202_v10, %v1063_v41 }
 0x391   : > { %v1184_v28 = vpop.f32.mrf.mxu1 }
 0x392   : > { %1240 = vst [vmem:[#allocation5 + $0x58] sm:$0xff] %v1224_v26  ;;  %v1217_v14 = vadd.f32 %v1184_v28, %v1056_v12 }
 0x394   : > { %1233 = vst [vmem:[#allocation5 + $0x18] sm:$0xff] %v1217_v14 }
 0x397   : > { %v1204_v30 = vpop.f32.mrf.mxu3 }
 0x398   : > { %v1225_v1 = vadd.f32 %v1204_v30, %v1064_v16 }
 0x399   : > { %v1187_v18 = vpop.f32.mrf.mxu1 }
 0x39a   : > { %1241 = vst [vmem:[#allocation5] sm:$0xff] %v1225_v1  ;;  %v1218_v20 = vadd.f32 %v1187_v18, %v1057_v32 }
 0x39c   : > { %1234 = vst [vmem:[#allocation5 + $0x60] sm:$0xff] %v1218_v20 }
 0x39f   : > { %v1207_v34 = vpop.f32.mrf.mxu3 }
 0x3a0   : > { %v1226_v56 = vadd.f32 %v1207_v34, %v1065_v55 }
 0x3a1   : > { %v1189_v22 = vpop.f32.mrf.mxu1 }
 0x3a2   : > { %1242 = vst [vmem:[#allocation5 + $0x38] sm:$0xff] %v1226_v56  ;;  %v1219_v24 = vadd.f32 %v1189_v22, %v1058_v36 }
 0x3a4   : > { %1235 = vst [vmem:[#allocation5 + $0x78] sm:$0xff] %v1219_v24 }
 0x3a7   : > { %v1209_v38 = vpop.f32.mrf.mxu3 }
 0x3a8   : > { %v1227_v40 = vadd.f32 %v1209_v38, %v1066_v57 }
 0x3aa   : > { %1243 = vst [vmem:[#allocation5 + $0x70] sm:$0xff] %v1227_v40 }
 0x3ab PF: > { %v1464_v58 = vld [vmem:[#allocation5 + $0x8] sm:$0xff]  ;;  %v1466_v61 = vld [vmem:[#allocation5 + $0x10] sm:$0xff]  ;;  %v1467_v62 = vld [vmem:[#allocation5 + $0x20] sm:$0xff]  ;;  %p1979_p7 = scmp.ge.s32.totalorder %s2271_s24, 2 }
 0x3ac   : > { %v1465_v59 = vld [vmem:[#allocation5 + $0x48] sm:$0xff]  ;;  %v1468_v63 = vld [vmem:[#allocation5 + $0x50] sm:$0xff]  ;;  %v1469_v0 = vld [vmem:[#allocation5 + $0x18] sm:$0xff] }
 0x3ad   : > { %v1470_v42 = vld [vmem:[#allocation5 + $0x60] sm:$0xff]  ;;  %v1471_v8 = vld [vmem:[#allocation5 + $0x78] sm:$0xff]  ;;  %v1472_v6 = vld [vmem:[#allocation5 + $0x28] sm:$0xff] }
 0x3ae   : > { %v1473_v46 = vld [vmem:[#allocation5 + $0x30] sm:$0xff]  ;;  %v2253_v47 = vld [vmem:[%s334_s9] ss:$0 sm:$0xff]  ;;  %v1475_v9 = vld [vmem:[#allocation5 + $0x68] sm:$0xff]  ;;  %1503 = sbr.rel (%p1979_p7) target bundleno = 959 (0x3bf), region = 92 }
 0x3af   : > { %v1474_v4 = vld [vmem:[#allocation5 + $0x40] sm:$0xff]  ;;  %v1476_v11 = vld [vmem:[#allocation5 + $0x58] sm:$0xff]  ;;  %v2536_v15 = vadd.f32 %v2253_v47, %v1464_v58  ;;  %v2538_v29 = vadd.f32 %v2253_v47, %v1465_v59  ;;  %v2540_v31 = vadd.f32 %v2253_v47, %v1466_v61  ;;  %v2542_v44 = vadd.f32 %v2253_v47, %v1467_v62 }
 0x3b0   : > { %v1477_v25 = vld [vmem:[#allocation5] sm:$0xff]  ;;  %v1478_v27 = vld [vmem:[#allocation5 + $0x38] sm:$0xff]  ;;  %v2544_v17 = vadd.f32 %v2253_v47, %v1468_v63  ;;  %v2546_v19 = vadd.f32 %v2253_v47, %v1469_v0  ;;  %v2548_v48 = vadd.f32 %v2253_v47, %v1470_v42  ;;  %v2550_v33 = vadd.f32 %v2253_v47, %v1471_v8 }
 0x3b1   : > { %v1479_v13 = vld [vmem:[#allocation5 + $0x70] sm:$0xff]  ;;  %v2552_v35 = vadd.f32 %v2253_v47, %v1472_v6  ;;  %v1493_v49 = vadd.f32 %v2253_v47, %v1473_v46  ;;  %v1494_v21 = vadd.f32 %v2253_v47, %v1474_v4  ;;  %v1495_v23 = vadd.f32 %v2253_v47, %v1475_v9 }
 0x3b2   : > { %v1496_v2 = vadd.f32 %v2253_v47, %v1476_v11  ;;  %v1497_v37 = vadd.f32 %v2253_v47, %v1477_v25  ;;  %v1498_v39 = vadd.f32 %v2253_v47, %v1478_v27  ;;  %v1499_v50 = vadd.f32 %v2253_v47, %v1479_v13 }
 0x3b3   : > { %v1504_v60 = vmax.f32 %v2536_v15, 0.0  ;;  %v1505_v51 = vmax.f32 %v2538_v29, 0.0  ;;  %v1506_v52 = vmax.f32 %v2540_v31, 0.0  ;;  %v1507_v43 = vmax.f32 %v2542_v44, 0.0 }
 0x3b4   : > { %v1508_v45 = vmax.f32 %v2544_v17, 0.0  ;;  %v1509_v53 = vmax.f32 %v2546_v19, 0.0  ;;  %v1510_v54 = vmax.f32 %v2548_v48, 0.0  ;;  %v1511_v7 = vmax.f32 %v2550_v33, 0.0 }
 0x3b5   : > { %v2137_v3 = vpack.c.bf16 %v1505_v51, %v1504_v60  ;;  %v2142_v5 = vpack.c.bf16 %v1507_v43, %v1506_v52  ;;  %v1512_v41 = vmax.f32 %v2552_v35, 0.0  ;;  %v1513_v10 = vmax.f32 %v1493_v49, 0.0 }
 0x3b6   : > { %v2147_v12 = vpack.c.bf16 %v1509_v53, %v1508_v45  ;;  %v2152_v26 = vpack.c.bf16 %v1511_v7, %v1510_v54  ;;  %v1514_v28 = vmax.f32 %v1494_v21, 0.0  ;;  %v1515_v14 = vmax.f32 %v1495_v23, 0.0 }
 0x3b7   : > { %2138 = vst [vmem:[#allocation3] sm:$0xff] %v2137_v3   ;;  %v2157_v16 = vpack.c.bf16 %v1513_v10, %v1512_v41  ;;  %v1516_v30 = vmax.f32 %v1496_v2, 0.0  ;;  %v1517_v32 = vmax.f32 %v1497_v37, 0.0  ;;  %v1518_v1 = vmax.f32 %v1498_v39, 0.0 }
 0x3b8   : > { %2188 = vst [vmem:[#allocation3 + $0x18] sm:$0xff] %v2142_v5   ;;  %v2162_v18 = vpack.c.bf16 %v1515_v14, %v1514_v28  ;;  %v1519_v20 = vmax.f32 %v1499_v50, 0.0 }
 0x3b9   : > { %2189 = vst [vmem:[#allocation3 + $0x10] sm:$0xff] %v2147_v12   ;;  %v2167_v55 = vpack.c.bf16 %v1517_v32, %v1516_v30 }
 0x3ba   : > { %2190 = vst [vmem:[#allocation3 + $0x20] sm:$0xff] %v2152_v26   ;;  %v2172_v34 = vpack.c.bf16 %v1519_v20, %v1518_v1 }
 0x3bb   : > { %2191 = vst [vmem:[#allocation3 + $0x28] sm:$0xff] %v2157_v16  }
 0x3bc   : > { %2192 = vst [vmem:[#allocation3 + $0x8] sm:$0xff] %v2162_v18  }
 0x3bd   : > { %2193 = vst [vmem:[#allocation3 + $0x30] sm:$0xff] %v2167_v55  }
 0x3be   : > { %2194 = vst [vmem:[#allocation3 + $0x38] sm:$0xff] %v2172_v34  }
 0x3bf PF: > { %p1980_p8 = scmp.ne.s32.totalorder %s2271_s24, 2 }
 0x3c1   : > { %1559 = sbr.rel (%p1980_p8) target bundleno = 1254 (0x4e6), region = 96 }
 0x3c6   : > { %1564 = vmatpush.msra.mxu0 %v1499_v50  ;;  %v1605_v36 = vld [vmem:[%s2645_s5 + $0x78] sm:$0xff]  ;;  %v1604_v56 = vld [vmem:[%s2645_s5 + $0x70] sm:$0xff]  ;;  %v1603_v22 = vld [vmem:[%s2645_s5 + $0x68] sm:$0xff] }
 0x3c7   : > { %1610 = vmatpush.msra.mxu1 %v1605_v36  ;;  %v1602_v24 = vld [vmem:[%s2645_s5 + $0x60] sm:$0xff]  ;;  %v1601_v57 = vld [vmem:[%s2645_s5 + $0x58] sm:$0xff]  ;;  %v1600_v38 = vld [vmem:[%s2645_s5 + $0x50] sm:$0xff] }
 0x3c8   : > { %1565 = vmatpush.msra.mxu0 %v1498_v39  ;;  %v1599_v40 = vld [vmem:[%s2645_s5 + $0x48] sm:$0xff]  ;;  %v1598_v58 = vld [vmem:[%s2645_s5 + $0x40] sm:$0xff]  ;;  %v1597_v59 = vld [vmem:[%s2645_s5 + $0x38] sm:$0xff] }
 0x3c9   : > { %1611 = vmatpush.msra.mxu1 %v1604_v56  ;;  %v1596_v61 = vld [vmem:[%s2645_s5 + $0x30] sm:$0xff]  ;;  %v1563_v62 = vld [vmem:[%s2644_s4] sm:$0xff]  ;;  %v1595_v63 = vld [vmem:[%s2645_s5 + $0x28] sm:$0xff] }
 0x3ca   : > { %1566 = vmatpush.msra.mxu0 %v1497_v37  ;;  %v1594_v0 = vld [vmem:[%s2645_s5 + $0x20] sm:$0xff]  ;;  %v1593_v42 = vld [vmem:[%s2645_s5 + $0x18] sm:$0xff]  ;;  %v1592_v8 = vld [vmem:[%s2645_s5 + $0x10] sm:$0xff] }
 0x3cb   : > { %1612 = vmatpush.msra.mxu1 %v1603_v22  ;;  %v1591_v6 = vld [vmem:[%s2645_s5 + $0x8] sm:$0xff]  ;;  %v1590_v46 = vld [vmem:[%s2645_s5] sm:$0xff] }
 0x3cc   : > { %1567 = vmatpush.msra.mxu0 %v1496_v2  ;;  %v1560_v47 = vld [vmem:[#allocation6] sm:$0xff] }
 0x3cd   : > { %1613 = vmatpush.msra.mxu1 %v1602_v24  ;;  %v2254_v11 = vld [vmem:[%s2646_s6] ss:$0 sm:$0xff] }
 0x3ce   : > { %1568 = vmatpush.msra.mxu0 %v1495_v23 }
 0x3cf   : > { %1614 = vmatpush.msra.mxu1 %v1601_v57 }
 0x3d0   : > { %1569 = vmatpush.msra.mxu0 %v1494_v21 }
 0x3d1   : > { %1615 = vmatpush.msra.mxu1 %v1600_v38 }
 0x3d2   : > { %1570 = vmatpush.msra.mxu0 %v1493_v49 }
 0x3d3   : > { %1616 = vmatpush.msra.mxu1 %v1599_v40 }
 0x3d4   : > { %1571 = vmatpush.msra.mxu0 %v2552_v35 }
 0x3d5   : > { %1617 = vmatpush.msra.mxu1 %v1598_v58 }
 0x3d6   : > { %1572 = vmatpush.msra.mxu0 %v2550_v33 }
 0x3d7   : > { %1618 = vmatpush.msra.mxu1 %v1597_v59 }
 0x3d8   : > { %1573 = vmatpush.msra.mxu0 %v2548_v48 }
 0x3d9   : > { %1619 = vmatpush.msra.mxu1 %v1596_v61 }
 0x3da   : > { %1574 = vmatpush.msra.mxu0 %v2546_v19 }
 0x3db   : > { %1620 = vmatpush.msra.mxu1 %v1595_v63 }
 0x3dc   : > { %1575 = vmatpush.msra.mxu0 %v2544_v17 }
 0x3dd   : > { %1621 = vmatpush.msra.mxu1 %v1594_v0 }
 0x3de   : > { %1576 = vmatpush.msra.mxu0 %v2542_v44 }
 0x3df   : > { %1622 = vmatpush.msra.mxu1 %v1593_v42 }
 0x3e0   : > { %1577 = vmatpush.msra.mxu0 %v2540_v31 }
 0x3e1   : > { %1623 = vmatpush.msra.mxu1 %v1592_v8 }
 0x3e2   : > { %1578 = vmatpush.msra.mxu0 %v2538_v29 }
 0x3e3   : > { %1624 = vmatpush.msra.mxu1 %v1591_v6 }
 0x3e4   : > { %1579 = vmatpush.msra.mxu0 %v2536_v15 }
 0x3e5   : > { %1580 = vmatmul.f32.vlgmr.msra.gmra.mxu0 %v1563_v62  ;;  %1625 = vmatpush.msra.mxu1 %v1590_v46 }
 0x462   : > { %v1581_v4 = vpop.f32.mrf.mxu0 }
 0x463   : > { %v1584_v9 = vadd.f32 %v1581_v4, %v1560_v47 }
 0x465   : > { %1585 = vst [vmem:[#allocation6] sm:$0xff] %v1584_v9  ;;  %1626 = vmatmul.f32.vlgmr.msra.gmra.mxu1 %v1584_v9 }
 0x4e2   : > { %v1627_v25 = vpop.f32.mrf.mxu1 }
 0x4e3   : > { %v1628_v27 = vadd.f32 %v2254_v11, %v1627_v25 }
 0x4e5   : > { %1630 = vst [vmem:[%s2647_s7] sm:$0xff] %v1628_v27 }
 0x4e6 PF: > { %s17_s26 = sadd.s32 1, %s2279_s26   ;;  %s2648_s24 = smov %s2275_s25 }
 0x4e7   : > { %p14_p9 = scmp.ge.s32.totalorder %s17_s26, 5   ;;  %s2649_s25 = smov %s2651_s27 }
 0x4e9   :  { %16 = sbr.rel (!%p14_p9) target bundleno = 2 (0x2), region = 143 }

</bundles_post_ra>
